<compile_context>
chip_gen: v7x
topology: tpu7x:2x2x1
jax: 0.10.0
libtpu: 0.0.40
codegen_flags: <defaults>
</compile_context>

<pallas_src>
import jax
import jax.numpy as jnp
from jax.experimental import pallas as pl
from jax.experimental.pallas import tpu as pltpu


# ----------------------------- in-kernel math ------------------------------

_N_MLP3 = 10   # w1 b1 g1 be1 w2 b2 g2 be2 w3 b3
_N_ENCF = 8    # fused encoders: w1a w1b w1c b1 g1 be1 w2 b2


def _mish(x):
    # mish(x) = x * tanh(softplus(x)).  Single-transcendental rewrite:
    #   with e = exp(x):  tanh(log1p(e)) = e*(e+2) / (e*(e+2) + 2)
    # Clamp the exp argument; mish(x) -> x for large positive x.  f32 math.
    xe = jnp.minimum(x, 20.0)
    e = jnp.exp(xe)
    t = e * (e + 2.0)
    return jnp.where(x > 20.0, x, x * t / (t + 2.0))


def _layernorm(x, gamma, beta, eps=1e-5):
    mean = jnp.mean(x, axis=-1, keepdims=True)
    var = jnp.mean(jnp.square(x - mean), axis=-1, keepdims=True)
    return (x - mean) * jax.lax.rsqrt(var + eps) * gamma + beta


def _layernorm_2group(x, half, gamma, beta, eps=1e-5):
    """Row-wise LayerNorm applied independently to lanes [0,half) / [half,2*half).

    Numerically identical to running two width-`half` LayerNorms on the two
    halves (= the two fused relation encoders), but keeps all elementwise work
    at full lane width.  Masked sums go to the XLU; math stays in f32.
    """
    lane = jax.lax.broadcasted_iota(jnp.int32, x.shape, x.ndim - 1)
    first = lane < half
    inv = 1.0 / float(half)
    m1 = jnp.sum(jnp.where(first, x, 0.0), axis=-1, keepdims=True) * inv
    m2 = jnp.sum(jnp.where(first, 0.0, x), axis=-1, keepdims=True) * inv
    mean = jnp.where(first, m1, m2)
    d = x - mean
    d2 = d * d
    v1 = jnp.sum(jnp.where(first, d2, 0.0), axis=-1, keepdims=True) * inv
    v2 = jnp.sum(jnp.where(first, 0.0, d2), axis=-1, keepdims=True) * inv
    var = jnp.where(first, v1, v2)
    return d * jax.lax.rsqrt(var + eps) * gamma + beta


def _mlp3(x, p):
    """3-layer MLP, plain_last: lin -> LN -> Mish -> lin -> LN -> Mish -> lin.

    Weights arrive in bf16 (MXU-native); activations are cast at each dot,
    accumulation / LN / Mish stay f32."""
    w1, b1, g1, be1, w2, b2, g2, be2, w3, b3 = p
    h = jnp.dot(x.astype(w1.dtype), w1, preferred_element_type=jnp.float32) + b1
    h = _mish(_layernorm(h, g1, be1))
    h = jnp.dot(h.astype(w2.dtype), w2, preferred_element_type=jnp.float32) + b2
    h = _mish(_layernorm(h, g2, be2))
    return jnp.dot(h.astype(w3.dtype), w3, preferred_element_type=jnp.float32) + b3


# --------------------------------- kernels -----------------------------------

def fused_embed_kernel(*refs):
    """3x MLP3 + BOTH 2-layer relation encoders fused, for one row tile.

    The feature concat is folded into a split-K first matmul; the two encoders
    are additionally fused along their output dim (hidden [tm, 2H], grouped
    LayerNorm, block-diagonal second weight), producing e12 = [e1 | e2]
    of shape [tm, 2R]."""
    x_lg = refs[0][...]
    x_cls = refs[1][...]
    x_seg = refs[2][...]
    i = 3
    pred_p = tuple(r[...] for r in refs[i:i + _N_MLP3]); i += _N_MLP3
    cls_p = tuple(r[...] for r in refs[i:i + _N_MLP3]); i += _N_MLP3
    segm_p = tuple(r[...] for r in refs[i:i + _N_MLP3]); i += _N_MLP3
    w1a, w1b, w1c, b1, g1, be1, w2, b2 = (r[...] for r in refs[i:i + _N_ENCF])
    i += _N_ENCF
    e12_ref = refs[i]

    pred_emb = _mlp3(x_lg, pred_p)     # [TM, F]
    cls_emb = _mlp3(x_cls, cls_p)      # [TM, F]
    seg_emb = _mlp3(x_seg, segm_p)     # [TM, F]

    # split-K first matmul == Linear(concat([pred, cls, seg], dim=1)) for BOTH
    # encoders at once (their w1 are concatenated along the output dim).
    h = (jnp.dot(pred_emb.astype(w1a.dtype), w1a, preferred_element_type=jnp.float32)
         + jnp.dot(cls_emb.astype(w1b.dtype), w1b, preferred_element_type=jnp.float32)
         + jnp.dot(seg_emb.astype(w1c.dtype), w1c, preferred_element_type=jnp.float32)
         + b1)                                             # [TM, 2H]
    half = g1.shape[-1] // 2
    h = _mish(_layernorm_2group(h, half, g1, be1))
    # Block-diagonal second weight keeps the two encoders independent:
    # columns [:R] = encoder1, [R:] = encoder2.
    o = jnp.dot(h.astype(w2.dtype), w2, preferred_element_type=jnp.float32) + b2
    e12_ref[...] = o.astype(e12_ref.dtype)                 # [TM, 2R]


def decoder_kernel(e1_ref, e2_ref, seg_ref, out_ref):
    # TODO(synk): FeatureRelationDecoderV2 source is not provided; this assumes
    # out[r, i, j] = (e1[i, r] + e2[j, r]) * seg[i, j]; cls_pred_label / batch
    # are unused.  Output layout is relation-major [R, N, N].
    #   e1_ref : [R, TI, 1]   e2_ref : [R, 1, TJ]   seg_ref : [1, TI, TJ]
    out = (e1_ref[...] + e2_ref[...]) * seg_ref[...]       # [R, TI, TJ]
    out_ref[...] = out.astype(out_ref.dtype)


# ------------------------------ pallas wrappers ------------------------------

def _vmem_capacity_bytes():
    try:
        return int(pltpu.get_tpu_info().vmem_capacity_bytes)
    except Exception:
        return 64 * 1024 * 1024   # conservative (v7x-sized) fallback


def _row_tile(n):
    # 128-256 keeps the MLP intermediates in-register (no vreg spills) and
    # gives v7x's two TensorCores at least 2 grid steps whenever n > 128.
    if n <= 128:
        return n
    return 128 if n <= 1024 else 256


def _pair_tile(n, cap):
    # Largest power-of-two tile <= cap that still yields >= 2 steps per axis.
    if n <= 128:
        return n
    t = 128
    while t * 2 <= cap and t * 2 <= n:
        t *= 2
    return t


def _run_fused_embed(params, local_global_feat, classify_emb, seg_emb):
    n = local_global_feat.shape[0]
    enc1, enc2 = params["rel_pred_encoder1"], params["rel_pred_encoder2"]
    num_rel = enc1["w2"].shape[1]
    hidden = enc1["w1a"].shape[1]
    tm = _row_tile(n)

    def wcast(a):                      # matmul weights -> bf16 (MXU native)
        return a.astype(jnp.bfloat16)

    def mlp3_args(p):
        return (wcast(p["w1"]), p["b1"], p["g1"], p["be1"],
                wcast(p["w2"]), p["b2"], p["g2"], p["be2"],
                wcast(p["w3"]), p["b3"])

    def cat(k):                        # fuse the two encoders along out dim
        return jnp.concatenate([enc1[k], enc2[k]], axis=1)

    w2_bd = jnp.zeros((2 * hidden, 2 * num_rel), jnp.float32)
    w2_bd = w2_bd.at[:hidden, :num_rel].set(enc1["w2"])
    w2_bd = w2_bd.at[hidden:, num_rel:].set(enc2["w2"])
    enc_args = (wcast(cat("w1a")), wcast(cat("w1b")), wcast(cat("w1c")),
                cat("b1"), cat("g1"), cat("be1"), wcast(w2_bd), cat("b2"))

    args = ((local_global_feat, classify_emb, seg_emb)
            + mlp3_args(params["prediction_emb"])
            + mlp3_args(params["classify_pred_emb"])
            + mlp3_args(params["seg_pred_emb"])
            + enc_args)

    def act_spec(d):
        return pl.BlockSpec((tm, d), lambda i: (i, 0))

    def resident_spec(a):
        # Weights/biases: whole array, same block every step -> stays in VMEM.
        return pl.BlockSpec(a.shape, lambda i: (0,) * a.ndim)

    in_specs = [act_spec(local_global_feat.shape[1]),
                act_spec(classify_emb.shape[1]),
                act_spec(seg_emb.shape[1])]
    in_specs += [resident_spec(a) for a in args[3:]]

    out_spec = pl.BlockSpec((tm, 2 * num_rel), lambda i: (i, 0))

    f_dim = local_global_feat.shape[1]
    c_dim = classify_emb.shape[1]
    s_dim = seg_emb.shape[1]
    fo = params["prediction_emb"]["w3"].shape[1]
    m3 = lambda ci, ch, co: ci * ch + ch * ch + ch * co
    flops = 2 * n * (m3(f_dim, 2 * f_dim, fo) + m3(c_dim, 2 * c_dim, fo)
                     + m3(s_dim, 2 * s_dim, fo)
                     + 3 * fo * 2 * hidden + 2 * hidden * 2 * num_rel)
    trans = n * (4 * f_dim + 4 * c_dim + 4 * s_dim + 2 * hidden)
    bytes_acc = (sum(int(a.size) * a.dtype.itemsize for a in args)
                 + n * 2 * num_rel * 4)
    ce = pl.CostEstimate(flops=int(flops), transcendentals=int(trans),
                         bytes_accessed=int(bytes_acc))

    return pl.pallas_call(
        fused_embed_kernel,
        out_shape=jax.ShapeDtypeStruct((n, 2 * num_rel), jnp.float32),
        grid=(pl.cdiv(n, tm),),
        in_specs=in_specs,
        out_specs=out_spec,
        compiler_params=pltpu.CompilerParams(
            dimension_semantics=("parallel",)),
        cost_estimate=ce,
    )(*args)


def _run_decoder(e12, seg_matrix):
    n = seg_matrix.shape[0]
    num_rel = e12.shape[1] // 2

    big_vmem = _vmem_capacity_bytes() >= 100 * 1024 * 1024   # v5e/v6e: 128 MiB
    t = _pair_tile(n, 512 if big_vmem else 256)              # v7x: keep 256

    # Tiny layout plumbing in XLA (a few KiB total): present e1 / e2 / seg in
    # broadcast-ready 3-D layouts so the decoder body is a single vectorized
    # expression with lane-dense [R, t, t] stores and NO in-kernel relayouts.
    # (The full R*N^2 output is written exactly once; no wrapper transpose.)
    e12t = e12.T                                    # [2R, N]   (tiny)
    e1_3d = e12t[:num_rel][:, :, None]              # [R, N, 1]
    e2_3d = e12t[num_rel:][:, None, :]              # [R, 1, N]
    seg_3d = seg_matrix.astype(jnp.float32)[None]   # [1, N, N]

    ce = pl.CostEstimate(
        flops=int(2 * num_rel * n * n),
        transcendentals=0,
        bytes_accessed=int(4 * (num_rel * n * n + n * n + 2 * num_rel * n)))

    cp = dict(dimension_semantics=("parallel", "parallel"))
    if t > 256:
        # ~18 MiB of double-buffered blocks at t=512; raise the scoped limit.
        cp["vmem_limit_bytes"] = 64 * 1024 * 1024

    return pl.pallas_call(
        decoder_kernel,
        out_shape=jax.ShapeDtypeStruct((num_rel, n, n), jnp.float32),
        grid=(pl.cdiv(n, t), pl.cdiv(n, t)),
        in_specs=[pl.BlockSpec((num_rel, t, 1), lambda i, j: (0, i, 0)),
                  pl.BlockSpec((num_rel, 1, t), lambda i, j: (0, 0, j)),
                  pl.BlockSpec((1, t, t), lambda i, j: (0, i, j))],
        out_specs=pl.BlockSpec((num_rel, t, t), lambda i, j: (0, i, j)),
        compiler_params=pltpu.CompilerParams(**cp),
        cost_estimate=ce,
    )(e1_3d, e2_3d, seg_3d)


# ------------------------------ parameter init -------------------------------

def _init_mlp3(key, in_dim, hidden_dim, out_dim):
    k = jax.random.split(key, 3)
    return {
        "w1": jax.random.normal(k[0], (in_dim, hidden_dim), jnp.float32) * 0.05,
        "b1": jnp.zeros((1, hidden_dim), jnp.float32),
        "g1": jnp.ones((1, hidden_dim), jnp.float32),
        "be1": jnp.zeros((1, hidden_dim), jnp.float32),
        "w2": jax.random.normal(k[1], (hidden_dim, hidden_dim), jnp.float32) * 0.05,
        "b2": jnp.zeros((1, hidden_dim), jnp.float32),
        "g2": jnp.ones((1, hidden_dim), jnp.float32),
        "be2": jnp.zeros((1, hidden_dim), jnp.float32),
        "w3": jax.random.normal(k[2], (hidden_dim, out_dim), jnp.float32) * 0.05,
        "b3": jnp.zeros((1, out_dim), jnp.float32),
    }


def _init_mlp2_splitk(key, chunk_dims, hidden_dim, out_dim):
    # First Linear's input is concat([pred, cls, seg]); store its weight
    # pre-split so the kernel folds the concat into a split-K matmul.
    k = jax.random.split(key, 4)
    return {
        "w1a": jax.random.normal(k[0], (chunk_dims[0], hidden_dim), jnp.float32) * 0.05,
        "w1b": jax.random.normal(k[1], (chunk_dims[1], hidden_dim), jnp.float32) * 0.05,
        "w1c": jax.random.normal(k[2], (chunk_dims[2], hidden_dim), jnp.float32) * 0.05,
        "b1": jnp.zeros((1, hidden_dim), jnp.float32),
        "g1": jnp.ones((1, hidden_dim), jnp.float32),
        "be1": jnp.zeros((1, hidden_dim), jnp.float32),
        "w2": jax.random.normal(k[3], (hidden_dim, out_dim), jnp.float32) * 0.05,
        "b2": jnp.zeros((1, out_dim), jnp.float32),
    }


def init_relation_pred_head_v2(key, classify_hidden_dim, segment_hidden_dim,
                               final_out_emb, predict_hidden_dim, num_relations):
    del segment_hidden_dim  # unused by the reference module's forward
    k = jax.random.split(key, 5)
    f = final_out_emb
    return {
        "classify_pred_emb": _init_mlp3(k[0], classify_hidden_dim,
                                        classify_hidden_dim * 2, f),
        "seg_pred_emb": _init_mlp3(k[1], f, f * 2, f),
        "prediction_emb": _init_mlp3(k[2], f, f * 2, f),
        "rel_pred_encoder1": _init_mlp2_splitk(k[3], (f, f, f),
                                               predict_hidden_dim, num_relations),
        "rel_pred_encoder2": _init_mlp2_splitk(k[4], (f, f, f),
                                               predict_hidden_dim, num_relations),
    }


# ---------------------------------- forward ----------------------------------

def relation_pred_head_v2_forward(params, local_global_feat, classify_emb,
                                  seg_emb, seg_matrix, cls_pred_label, batch):
    """Relation logits with layout [num_relations, N, N].

    NOTE: the output contract is relation-major [R, N, N] (lane-dense TPU
    stores, no extra HBM round trip for a layout transpose).  Consumers that
    need the pair-major [N, N, R] view can take out.transpose(1, 2, 0)."""
    del cls_pred_label, batch  # see TODO(synk) in decoder_kernel
    e12 = _run_fused_embed(params, local_global_feat, classify_emb, seg_emb)
    return _run_decoder(e12, seg_matrix)


# ------------------------------------ main ------------------------------------

if __name__ == "__main__":
    # small config
    N = 16                     # number of nodes / elements
    classify_hidden_dim = 32
    segment_hidden_dim = 32
    final_out_emb = 32
    predict_hidden_dim = 64
    num_relations = 8

    key = jax.random.PRNGKey(0)
    kp, k1, k2, k3, k4 = jax.random.split(key, 5)

    params = init_relation_pred_head_v2(
        kp, classify_hidden_dim, segment_hidden_dim,
        final_out_emb, predict_hidden_dim, num_relations)

    local_global_feat = jax.random.normal(k1, (N, final_out_emb), jnp.float32)
    classify_emb = jax.random.normal(k2, (N, classify_hidden_dim), jnp.float32)
    seg_emb = jax.random.normal(k3, (N, final_out_emb), jnp.float32)
    seg_matrix = (jax.random.uniform(k4, (N, N)) > 0.5).astype(jnp.float32)
    cls_pred_label = jnp.zeros((N,), jnp.int32)
    batch = jnp.zeros((N,), jnp.int32)

    fwd = jax.jit(relation_pred_head_v2_forward)
    out = fwd(params, local_global_feat, classify_emb, seg_emb,
              seg_matrix, cls_pred_label, batch)
    jax.block_until_ready(out)
    assert out.shape == (num_relations, N, N)
    assert bool(jnp.all(jnp.isfinite(out)))
    print("KERNEL_OK")
</pallas_src>

<mosaic_0001>
module attributes {stable_mosaic.version = 11 : i64} {
  func.func @decoder_kernel(%arg0: i32, %arg1: i32, %arg2: memref<8x16x1xf32, #tpu.memory_space<vmem>>, %arg3: memref<8x1x16xf32, #tpu.memory_space<vmem>>, %arg4: memref<1x16x16xf32, #tpu.memory_space<vmem>>, %arg5: memref<8x16x16xf32, #tpu.memory_space<vmem>>) attributes {dimension_semantics = [#tpu.dimension_semantics<parallel>, #tpu.dimension_semantics<parallel>], iteration_bounds = array<i64: 1, 1>, scalar_prefetch = 0 : i64, scratch_operands = 0 : i64, tpu.core_type = #tpu.core_type<tc>, window_params = [{transform_indices = @transform_0, window_bounds = array<i64: 8, 16, 1>}, {transform_indices = @transform_1, window_bounds = array<i64: 8, 1, 16>}, {transform_indices = @transform_2, window_bounds = array<i64: 1, 16, 16>}, {transform_indices = @transform_3, window_bounds = array<i64: 8, 16, 16>}]} {
    %c0 = arith.constant 0 : index
    %c0_0 = arith.constant 0 : index
    %c0_1 = arith.constant 0 : index
    %0 = vector.load %arg2[%c0, %c0_0, %c0_1] : memref<8x16x1xf32, #tpu.memory_space<vmem>>, vector<8x16x1xf32>
    %c0_2 = arith.constant 0 : index
    %c0_3 = arith.constant 0 : index
    %c0_4 = arith.constant 0 : index
    %1 = vector.load %arg3[%c0_2, %c0_3, %c0_4] : memref<8x1x16xf32, #tpu.memory_space<vmem>>, vector<8x1x16xf32>
    %2 = vector.broadcast %0 : vector<8x16x1xf32> to vector<8x16x16xf32>
    %3 = vector.broadcast %1 : vector<8x1x16xf32> to vector<8x16x16xf32>
    %4 = arith.addf %2, %3 : vector<8x16x16xf32>
    %c0_5 = arith.constant 0 : index
    %c0_6 = arith.constant 0 : index
    %c0_7 = arith.constant 0 : index
    %5 = vector.load %arg4[%c0_5, %c0_6, %c0_7] : memref<1x16x16xf32, #tpu.memory_space<vmem>>, vector<1x16x16xf32>
    %6 = vector.broadcast %5 : vector<1x16x16xf32> to vector<8x16x16xf32>
    %7 = arith.mulf %4, %6 : vector<8x16x16xf32>
    %c0_8 = arith.constant 0 : index
    %c0_9 = arith.constant 0 : index
    %c0_10 = arith.constant 0 : index
    %8 = vector.load %arg5[%c0_8, %c0_9, %c0_10] : memref<8x16x16xf32, #tpu.memory_space<vmem>>, vector<8x16x16xf32>
    tpu.vector_store %arg5[%c0_8, %c0_9, %c0_10], %7 {strides = array<i32>} : memref<8x16x16xf32, #tpu.memory_space<vmem>>, vector<8x16x16xf32>,
    return
  }
  func.func @transform_0(%arg0: i32, %arg1: i32) -> (i32, i32, i32) {
    %c0_i32 = arith.constant 0 : i32
    %c0_i32_0 = arith.constant 0 : i32
    %c0_i32_1 = arith.constant 0 : i32
    return %c0_i32, %arg0, %c0_i32_0 : i32, i32, i32
  }
  func.func @transform_1(%arg0: i32, %arg1: i32) -> (i32, i32, i32) {
    %c0_i32 = arith.constant 0 : i32
    %c0_i32_0 = arith.constant 0 : i32
    %c0_i32_1 = arith.constant 0 : i32
    return %c0_i32, %c0_i32_0, %arg1 : i32, i32, i32
  }
  func.func @transform_2(%arg0: i32, %arg1: i32) -> (i32, i32, i32) {
    %c0_i32 = arith.constant 0 : i32
    %c0_i32_0 = arith.constant 0 : i32
    return %c0_i32, %arg0, %arg1 : i32, i32, i32
  }
  func.func @transform_3(%arg0: i32, %arg1: i32) -> (i32, i32, i32) {
    %c0_i32 = arith.constant 0 : i32
    %c0_i32_0 = arith.constant 0 : i32
    return %c0_i32, %arg0, %arg1 : i32, i32, i32
  }
}

module attributes {stable_mosaic.version = 11 : i64} {
  func.func @fused_embed_kernel(%arg0: i32, %arg1: memref<16x32xf32, #tpu.memory_space<vmem>>, %arg2: memref<16x32xf32, #tpu.memory_space<vmem>>, %arg3: memref<16x32xf32, #tpu.memory_space<vmem>>, %arg4: memref<32x64xbf16, #tpu.memory_space<vmem>>, %arg5: memref<1x64xf32, #tpu.memory_space<vmem>>, %arg6: memref<1x64xf32, #tpu.memory_space<vmem>>, %arg7: memref<1x64xf32, #tpu.memory_space<vmem>>, %arg8: memref<64x64xbf16, #tpu.memory_space<vmem>>, %arg9: memref<1x64xf32, #tpu.memory_space<vmem>>, %arg10: memref<1x64xf32, #tpu.memory_space<vmem>>, %arg11: memref<1x64xf32, #tpu.memory_space<vmem>>, %arg12: memref<64x32xbf16, #tpu.memory_space<vmem>>, %arg13: memref<1x32xf32, #tpu.memory_space<vmem>>, %arg14: memref<32x64xbf16, #tpu.memory_space<vmem>>, %arg15: memref<1x64xf32, #tpu.memory_space<vmem>>, %arg16: memref<1x64xf32, #tpu.memory_space<vmem>>, %arg17: memref<1x64xf32, #tpu.memory_space<vmem>>, %arg18: memref<64x64xbf16, #tpu.memory_space<vmem>>, %arg19: memref<1x64xf32, #tpu.memory_space<vmem>>, %arg20: memref<1x64xf32, #tpu.memory_space<vmem>>, %arg21: memref<1x64xf32, #tpu.memory_space<vmem>>, %arg22: memref<64x32xbf16, #tpu.memory_space<vmem>>, %arg23: memref<1x32xf32, #tpu.memory_space<vmem>>, %arg24: memref<32x64xbf16, #tpu.memory_space<vmem>>, %arg25: memref<1x64xf32, #tpu.memory_space<vmem>>, %arg26: memref<1x64xf32, #tpu.memory_space<vmem>>, %arg27: memref<1x64xf32, #tpu.memory_space<vmem>>, %arg28: memref<64x64xbf16, #tpu.memory_space<vmem>>, %arg29: memref<1x64xf32, #tpu.memory_space<vmem>>, %arg30: memref<1x64xf32, #tpu.memory_space<vmem>>, %arg31: memref<1x64xf32, #tpu.memory_space<vmem>>, %arg32: memref<64x32xbf16, #tpu.memory_space<vmem>>, %arg33: memref<1x32xf32, #tpu.memory_space<vmem>>, %arg34: memref<32x128xbf16, #tpu.memory_space<vmem>>, %arg35: memref<32x128xbf16, #tpu.memory_space<vmem>>, %arg36: memref<32x128xbf16, #tpu.memory_space<vmem>>, %arg37: memref<1x128xf32, #tpu.memory_space<vmem>>, %arg38: memref<1x128xf32, #tpu.memory_space<vmem>>, %arg39: memref<1x128xf32, #tpu.memory_space<vmem>>, %arg40: memref<128x16xbf16, #tpu.memory_space<vmem>>, %arg41: memref<1x16xf32, #tpu.memory_space<vmem>>, %arg42: memref<16x16xf32, #tpu.memory_space<vmem>>) attributes {dimension_semantics = [#tpu.dimension_semantics<parallel>], iteration_bounds = array<i64: 1>, scalar_prefetch = 0 : i64, scratch_operands = 0 : i64, tpu.core_type = #tpu.core_type<tc>, window_params = [{transform_indices = @transform_0, window_bounds = array<i64: 16, 32>}, {transform_indices = @transform_1, window_bounds = array<i64: 16, 32>}, {transform_indices = @transform_2, window_bounds = array<i64: 16, 32>}, {pipeline_mode = #tpu.pipeline_mode<synchronous>, transform_indices = @transform_3, window_bounds = array<i64: 32, 64>}, {pipeline_mode = #tpu.pipeline_mode<synchronous>, transform_indices = @transform_4, window_bounds = array<i64: 1, 64>}, {pipeline_mode = #tpu.pipeline_mode<synchronous>, transform_indices = @transform_5, window_bounds = array<i64: 1, 64>}, {pipeline_mode = #tpu.pipeline_mode<synchronous>, transform_indices = @transform_6, window_bounds = array<i64: 1, 64>}, {pipeline_mode = #tpu.pipeline_mode<synchronous>, transform_indices = @transform_7, window_bounds = array<i64: 64, 64>}, {pipeline_mode = #tpu.pipeline_mode<synchronous>, transform_indices = @transform_8, window_bounds = array<i64: 1, 64>}, {pipeline_mode = #tpu.pipeline_mode<synchronous>, transform_indices = @transform_9, window_bounds = array<i64: 1, 64>}, {pipeline_mode = #tpu.pipeline_mode<synchronous>, transform_indices = @transform_10, window_bounds = array<i64: 1, 64>}, {pipeline_mode = #tpu.pipeline_mode<synchronous>, transform_indices = @transform_11, window_bounds = array<i64: 64, 32>}, {pipeline_mode = #tpu.pipeline_mode<synchronous>, transform_indices = @transform_12, window_bounds = array<i64: 1, 32>}, {pipeline_mode = #tpu.pipeline_mode<synchronous>, transform_indices = @transform_13, window_bounds = array<i64: 32, 64>}, {pipeline_mode = #tpu.pipeline_mode<synchronous>, transform_indices = @transform_14, window_bounds = array<i64: 1, 64>}, {pipeline_mode = #tpu.pipeline_mode<synchronous>, transform_indices = @transform_15, window_bounds = array<i64: 1, 64>}, {pipeline_mode = #tpu.pipeline_mode<synchronous>, transform_indices = @transform_16, window_bounds = array<i64: 1, 64>}, {pipeline_mode = #tpu.pipeline_mode<synchronous>, transform_indices = @transform_17, window_bounds = array<i64: 64, 64>}, {pipeline_mode = #tpu.pipeline_mode<synchronous>, transform_indices = @transform_18, window_bounds = array<i64: 1, 64>}, {pipeline_mode = #tpu.pipeline_mode<synchronous>, transform_indices = @transform_19, window_bounds = array<i64: 1, 64>}, {pipeline_mode = #tpu.pipeline_mode<synchronous>, transform_indices = @transform_20, window_bounds = array<i64: 1, 64>}, {pipeline_mode = #tpu.pipeline_mode<synchronous>, transform_indices = @transform_21, window_bounds = array<i64: 64, 32>}, {pipeline_mode = #tpu.pipeline_mode<synchronous>, transform_indices = @transform_22, window_bounds = array<i64: 1, 32>}, {pipeline_mode = #tpu.pipeline_mode<synchronous>, transform_indices = @transform_23, window_bounds = array<i64: 32, 64>}, {pipeline_mode = #tpu.pipeline_mode<synchronous>, transform_indices = @transform_24, window_bounds = array<i64: 1, 64>}, {pipeline_mode = #tpu.pipeline_mode<synchronous>, transform_indices = @transform_25, window_bounds = array<i64: 1, 64>}, {pipeline_mode = #tpu.pipeline_mode<synchronous>, transform_indices = @transform_26, window_bounds = array<i64: 1, 64>}, {pipeline_mode = #tpu.pipeline_mode<synchronous>, transform_indices = @transform_27, window_bounds = array<i64: 64, 64>}, {pipeline_mode = #tpu.pipeline_mode<synchronous>, transform_indices = @transform_28, window_bounds = array<i64: 1, 64>}, {pipeline_mode = #tpu.pipeline_mode<synchronous>, transform_indices = @transform_29, window_bounds = array<i64: 1, 64>}, {pipeline_mode = #tpu.pipeline_mode<synchronous>, transform_indices = @transform_30, window_bounds = array<i64: 1, 64>}, {pipeline_mode = #tpu.pipeline_mode<synchronous>, transform_indices = @transform_31, window_bounds = array<i64: 64, 32>}, {pipeline_mode = #tpu.pipeline_mode<synchronous>, transform_indices = @transform_32, window_bounds = array<i64: 1, 32>}, {pipeline_mode = #tpu.pipeline_mode<synchronous>, transform_indices = @transform_33, window_bounds = array<i64: 32, 128>}, {pipeline_mode = #tpu.pipeline_mode<synchronous>, transform_indices = @transform_34, window_bounds = array<i64: 32, 128>}, {pipeline_mode = #tpu.pipeline_mode<synchronous>, transform_indices = @transform_35, window_bounds = array<i64: 32, 128>}, {pipeline_mode = #tpu.pipeline_mode<synchronous>, transform_indices = @transform_36, window_bounds = array<i64: 1, 128>}, {pipeline_mode = #tpu.pipeline_mode<synchronous>, transform_indices = @transform_37, window_bounds = array<i64: 1, 128>}, {pipeline_mode = #tpu.pipeline_mode<synchronous>, transform_indices = @transform_38, window_bounds = array<i64: 1, 128>}, {pipeline_mode = #tpu.pipeline_mode<synchronous>, transform_indices = @transform_39, window_bounds = array<i64: 128, 16>}, {pipeline_mode = #tpu.pipeline_mode<synchronous>, transform_indices = @transform_40, window_bounds = array<i64: 1, 16>}, {transform_indices = @transform_41, window_bounds = array<i64: 16, 16>}]} {
    %c0 = arith.constant 0 : index
    %c0_0 = arith.constant 0 : index
    %0 = vector.load %arg1[%c0, %c0_0] : memref<16x32xf32, #tpu.memory_space<vmem>>, vector<16x32xf32>
    %c0_1 = arith.constant 0 : index
    %c0_2 = arith.constant 0 : index
    %1 = vector.load %arg2[%c0_1, %c0_2] : memref<16x32xf32, #tpu.memory_space<vmem>>, vector<16x32xf32>
    %c0_3 = arith.constant 0 : index
    %c0_4 = arith.constant 0 : index
    %2 = vector.load %arg3[%c0_3, %c0_4] : memref<16x32xf32, #tpu.memory_space<vmem>>, vector<16x32xf32>
    %c0_5 = arith.constant 0 : index
    %c0_6 = arith.constant 0 : index
    %3 = vector.load %arg4[%c0_5, %c0_6] : memref<32x64xbf16, #tpu.memory_space<vmem>>, vector<32x64xbf16>
    %c0_7 = arith.constant 0 : index
    %c0_8 = arith.constant 0 : index
    %4 = vector.load %arg5[%c0_7, %c0_8] : memref<1x64xf32, #tpu.memory_space<vmem>>, vector<1x64xf32>
    %c0_9 = arith.constant 0 : index
    %c0_10 = arith.constant 0 : index
    %5 = vector.load %arg6[%c0_9, %c0_10] : memref<1x64xf32, #tpu.memory_space<vmem>>, vector<1x64xf32>
    %c0_11 = arith.constant 0 : index
    %c0_12 = arith.constant 0 : index
    %6 = vector.load %arg7[%c0_11, %c0_12] : memref<1x64xf32, #tpu.memory_space<vmem>>, vector<1x64xf32>
    %c0_13 = arith.constant 0 : index
    %c0_14 = arith.constant 0 : index
    %7 = vector.load %arg8[%c0_13, %c0_14] : memref<64x64xbf16, #tpu.memory_space<vmem>>, vector<64x64xbf16>
    %c0_15 = arith.constant 0 : index
    %c0_16 = arith.constant 0 : index
    %8 = vector.load %arg9[%c0_15, %c0_16] : memref<1x64xf32, #tpu.memory_space<vmem>>, vector<1x64xf32>
    %c0_17 = arith.constant 0 : index
    %c0_18 = arith.constant 0 : index
    %9 = vector.load %arg10[%c0_17, %c0_18] : memref<1x64xf32, #tpu.memory_space<vmem>>, vector<1x64xf32>
    %c0_19 = arith.constant 0 : index
    %c0_20 = arith.constant 0 : index
    %10 = vector.load %arg11[%c0_19, %c0_20] : memref<1x64xf32, #tpu.memory_space<vmem>>, vector<1x64xf32>
    %c0_21 = arith.constant 0 : index
    %c0_22 = arith.constant 0 : index
    %11 = vector.load %arg12[%c0_21, %c0_22] : memref<64x32xbf16, #tpu.memory_space<vmem>>, vector<64x32xbf16>
    %c0_23 = arith.constant 0 : index
    %c0_24 = arith.constant 0 : index
    %12 = vector.load %arg13[%c0_23, %c0_24] : memref<1x32xf32, #tpu.memory_space<vmem>>, vector<1x32xf32>
    %c0_25 = arith.constant 0 : index
    %c0_26 = arith.constant 0 : index
    %13 = vector.load %arg14[%c0_25, %c0_26] : memref<32x64xbf16, #tpu.memory_space<vmem>>, vector<32x64xbf16>
    %c0_27 = arith.constant 0 : index
    %c0_28 = arith.constant 0 : index
    %14 = vector.load %arg15[%c0_27, %c0_28] : memref<1x64xf32, #tpu.memory_space<vmem>>, vector<1x64xf32>
    %c0_29 = arith.constant 0 : index
    %c0_30 = arith.constant 0 : index
    %15 = vector.load %arg16[%c0_29, %c0_30] : memref<1x64xf32, #tpu.memory_space<vmem>>, vector<1x64xf32>
    %c0_31 = arith.constant 0 : index
    %c0_32 = arith.constant 0 : index
    %16 = vector.load %arg17[%c0_31, %c0_32] : memref<1x64xf32, #tpu.memory_space<vmem>>, vector<1x64xf32>
    %c0_33 = arith.constant 0 : index
    %c0_34 = arith.constant 0 : index
    %17 = vector.load %arg18[%c0_33, %c0_34] : memref<64x64xbf16, #tpu.memory_space<vmem>>, vector<64x64xbf16>
    %c0_35 = arith.constant 0 : index
    %c0_36 = arith.constant 0 : index
    %18 = vector.load %arg19[%c0_35, %c0_36] : memref<1x64xf32, #tpu.memory_space<vmem>>, vector<1x64xf32>
    %c0_37 = arith.constant 0 : index
    %c0_38 = arith.constant 0 : index
    %19 = vector.load %arg20[%c0_37, %c0_38] : memref<1x64xf32, #tpu.memory_space<vmem>>, vector<1x64xf32>
    %c0_39 = arith.constant 0 : index
    %c0_40 = arith.constant 0 : index
    %20 = vector.load %arg21[%c0_39, %c0_40] : memref<1x64xf32, #tpu.memory_space<vmem>>, vector<1x64xf32>
    %c0_41 = arith.constant 0 : index
    %c0_42 = arith.constant 0 : index
    %21 = vector.load %arg22[%c0_41, %c0_42] : memref<64x32xbf16, #tpu.memory_space<vmem>>, vector<64x32xbf16>
    %c0_43 = arith.constant 0 : index
    %c0_44 = arith.constant 0 : index
    %22 = vector.load %arg23[%c0_43, %c0_44] : memref<1x32xf32, #tpu.memory_space<vmem>>, vector<1x32xf32>
    %c0_45 = arith.constant 0 : index
    %c0_46 = arith.constant 0 : index
    %23 = vector.load %arg24[%c0_45, %c0_46] : memref<32x64xbf16, #tpu.memory_space<vmem>>, vector<32x64xbf16>
    %c0_47 = arith.constant 0 : index
    %c0_48 = arith.constant 0 : index
    %24 = vector.load %arg25[%c0_47, %c0_48] : memref<1x64xf32, #tpu.memory_space<vmem>>, vector<1x64xf32>
    %c0_49 = arith.constant 0 : index
    %c0_50 = arith.constant 0 : index
    %25 = vector.load %arg26[%c0_49, %c0_50] : memref<1x64xf32, #tpu.memory_space<vmem>>, vector<1x64xf32>
    %c0_51 = arith.constant 0 : index
    %c0_52 = arith.constant 0 : index
    %26 = vector.load %arg27[%c0_51, %c0_52] : memref<1x64xf32, #tpu.memory_space<vmem>>, vector<1x64xf32>
    %c0_53 = arith.constant 0 : index
    %c0_54 = arith.constant 0 : index
    %27 = vector.load %arg28[%c0_53, %c0_54] : memref<64x64xbf16, #tpu.memory_space<vmem>>, vector<64x64xbf16>
    %c0_55 = arith.constant 0 : index
    %c0_56 = arith.constant 0 : index
    %28 = vector.load %arg29[%c0_55, %c0_56] : memref<1x64xf32, #tpu.memory_space<vmem>>, vector<1x64xf32>
    %c0_57 = arith.constant 0 : index
    %c0_58 = arith.constant 0 : index
    %29 = vector.load %arg30[%c0_57, %c0_58] : memref<1x64xf32, #tpu.memory_space<vmem>>, vector<1x64xf32>
    %c0_59 = arith.constant 0 : index
    %c0_60 = arith.constant 0 : index
    %30 = vector.load %arg31[%c0_59, %c0_60] : memref<1x64xf32, #tpu.memory_space<vmem>>, vector<1x64xf32>
    %c0_61 = arith.constant 0 : index
    %c0_62 = arith.constant 0 : index
    %31 = vector.load %arg32[%c0_61, %c0_62] : memref<64x32xbf16, #tpu.memory_space<vmem>>, vector<64x32xbf16>
    %c0_63 = arith.constant 0 : index
    %c0_64 = arith.constant 0 : index
    %32 = vector.load %arg33[%c0_63, %c0_64] : memref<1x32xf32, #tpu.memory_space<vmem>>, vector<1x32xf32>
    %c0_65 = arith.constant 0 : index
    %c0_66 = arith.constant 0 : index
    %33 = vector.load %arg34[%c0_65, %c0_66] : memref<32x128xbf16, #tpu.memory_space<vmem>>, vector<32x128xbf16>
    %c0_67 = arith.constant 0 : index
    %c0_68 = arith.constant 0 : index
    %34 = vector.load %arg35[%c0_67, %c0_68] : memref<32x128xbf16, #tpu.memory_space<vmem>>, vector<32x128xbf16>
    %c0_69 = arith.constant 0 : index
    %c0_70 = arith.constant 0 : index
    %35 = vector.load %arg36[%c0_69, %c0_70] : memref<32x128xbf16, #tpu.memory_space<vmem>>, vector<32x128xbf16>
    %c0_71 = arith.constant 0 : index
    %c0_72 = arith.constant 0 : index
    %36 = vector.load %arg37[%c0_71, %c0_72] : memref<1x128xf32, #tpu.memory_space<vmem>>, vector<1x128xf32>
    %c0_73 = arith.constant 0 : index
    %c0_74 = arith.constant 0 : index
    %37 = vector.load %arg38[%c0_73, %c0_74] : memref<1x128xf32, #tpu.memory_space<vmem>>, vector<1x128xf32>
    %c0_75 = arith.constant 0 : index
    %c0_76 = arith.constant 0 : index
    %38 = vector.load %arg39[%c0_75, %c0_76] : memref<1x128xf32, #tpu.memory_space<vmem>>, vector<1x128xf32>
    %c0_77 = arith.constant 0 : index
    %c0_78 = arith.constant 0 : index
    %39 = vector.load %arg40[%c0_77, %c0_78] : memref<128x16xbf16, #tpu.memory_space<vmem>>, vector<128x16xbf16>
    %c0_79 = arith.constant 0 : index
    %c0_80 = arith.constant 0 : index
    %40 = vector.load %arg41[%c0_79, %c0_80] : memref<1x16xf32, #tpu.memory_space<vmem>>, vector<1x16xf32>
    %41 = arith.truncf %0 : vector<16x32xf32> to vector<16x32xbf16>
    %cst = arith.constant dense<0.000000e+00> : vector<16x64xf32>
    %42 = tpu.matmul %41, %3, %cst {dimension_numbers = #tpu.dot_dimension_numbers<[1], [0], [0], [1], [0, 0, 1, 1], [], []>} : vector<16x32xbf16>, vector<32x64xbf16>, vector<16x64xf32> -> vector<16x64xf32>
    %43 = vector.broadcast %4 : vector<1x64xf32> to vector<16x64xf32>
    %44 = arith.addf %42, %43 : vector<16x64xf32>
    %cst_81 = arith.constant dense<0.000000e+00> : vector<16xf32>
    %45 = vector.multi_reduction <add>, %44, %cst_81 [1] : vector<16x64xf32> to vector<16xf32>
    %46 = vector.shape_cast %45 : vector<16xf32> to vector<16x1xf32>
    %cst_82 = arith.constant 6.400000e+01 : f32
    %47 = vector.broadcast %cst_82 : f32 to vector<16x1xf32>
    %48 = arith.divf %46, %47 : vector<16x1xf32>
    %49 = vector.broadcast %48 : vector<16x1xf32> to vector<16x64xf32>
    %50 = arith.subf %44, %49 : vector<16x64xf32>
    %51 = arith.mulf %50, %50 : vector<16x64xf32>
    %cst_83 = arith.constant dense<0.000000e+00> : vector<16xf32>
    %52 = vector.multi_reduction <add>, %51, %cst_83 [1] : vector<16x64xf32> to vector<16xf32>
    %53 = vector.shape_cast %52 : vector<16xf32> to vector<16x1xf32>
    %cst_84 = arith.constant 6.400000e+01 : f32
    %54 = vector.broadcast %cst_84 : f32 to vector<16x1xf32>
    %55 = arith.divf %53, %54 : vector<16x1xf32>
    %56 = vector.broadcast %48 : vector<16x1xf32> to vector<16x64xf32>
    %57 = arith.subf %44, %56 : vector<16x64xf32>
    %cst_85 = arith.constant 9.99999974E-6 : f32
    %58 = vector.broadcast %cst_85 : f32 to vector<16x1xf32>
    %59 = arith.addf %55, %58 : vector<16x1xf32>
    %60 = math.rsqrt %59 : vector<16x1xf32>
    %61 = vector.broadcast %60 : vector<16x1xf32> to vector<16x64xf32>
    %62 = arith.mulf %57, %61 : vector<16x64xf32>
    %63 = vector.broadcast %5 : vector<1x64xf32> to vector<16x64xf32>
    %64 = arith.mulf %62, %63 : vector<16x64xf32>
    %65 = vector.broadcast %6 : vector<1x64xf32> to vector<16x64xf32>
    %66 = arith.addf %64, %65 : vector<16x64xf32>
    %cst_86 = arith.constant 2.000000e+01 : f32
    %67 = vector.broadcast %cst_86 : f32 to vector<16x64xf32>
    %68 = arith.minimumf %66, %67 : vector<16x64xf32>
    %69 = math.exp %68 : vector<16x64xf32>
    %cst_87 = arith.constant 2.000000e+00 : f32
    %70 = vector.broadcast %cst_87 : f32 to vector<16x64xf32>
    %71 = arith.addf %69, %70 : vector<16x64xf32>
    %72 = arith.mulf %69, %71 : vector<16x64xf32>
    %cst_88 = arith.constant 2.000000e+01 : f32
    %73 = vector.broadcast %cst_88 : f32 to vector<16x64xf32>
    %74 = arith.cmpf ogt, %66, %73 : vector<16x64xf32>
    %75 = arith.mulf %66, %72 : vector<16x64xf32>
    %cst_89 = arith.constant 2.000000e+00 : f32
    %76 = vector.broadcast %cst_89 : f32 to vector<16x64xf32>
    %77 = arith.addf %72, %76 : vector<16x64xf32>
    %78 = arith.divf %75, %77 : vector<16x64xf32>
    %79 = arith.select %74, %66, %78 : vector<16x64xi1>, vector<16x64xf32>
    %80 = arith.truncf %79 : vector<16x64xf32> to vector<16x64xbf16>
    %cst_90 = arith.constant dense<0.000000e+00> : vector<16x64xf32>
    %81 = tpu.matmul %80, %7, %cst_90 {dimension_numbers = #tpu.dot_dimension_numbers<[1], [0], [0], [1], [0, 0, 1, 1], [], []>} : vector<16x64xbf16>, vector<64x64xbf16>, vector<16x64xf32> -> vector<16x64xf32>
    %82 = vector.broadcast %8 : vector<1x64xf32> to vector<16x64xf32>
    %83 = arith.addf %81, %82 : vector<16x64xf32>
    %cst_91 = arith.constant dense<0.000000e+00> : vector<16xf32>
    %84 = vector.multi_reduction <add>, %83, %cst_91 [1] : vector<16x64xf32> to vector<16xf32>
    %85 = vector.shape_cast %84 : vector<16xf32> to vector<16x1xf32>
    %cst_92 = arith.constant 6.400000e+01 : f32
    %86 = vector.broadcast %cst_92 : f32 to vector<16x1xf32>
    %87 = arith.divf %85, %86 : vector<16x1xf32>
    %88 = vector.broadcast %87 : vector<16x1xf32> to vector<16x64xf32>
    %89 = arith.subf %83, %88 : vector<16x64xf32>
    %90 = arith.mulf %89, %89 : vector<16x64xf32>
    %cst_93 = arith.constant dense<0.000000e+00> : vector<16xf32>
    %91 = vector.multi_reduction <add>, %90, %cst_93 [1] : vector<16x64xf32> to vector<16xf32>
    %92 = vector.shape_cast %91 : vector<16xf32> to vector<16x1xf32>
    %cst_94 = arith.constant 6.400000e+01 : f32
    %93 = vector.broadcast %cst_94 : f32 to vector<16x1xf32>
    %94 = arith.divf %92, %93 : vector<16x1xf32>
    %95 = vector.broadcast %87 : vector<16x1xf32> to vector<16x64xf32>
    %96 = arith.subf %83, %95 : vector<16x64xf32>
    %cst_95 = arith.constant 9.99999974E-6 : f32
    %97 = vector.broadcast %cst_95 : f32 to vector<16x1xf32>
    %98 = arith.addf %94, %97 : vector<16x1xf32>
    %99 = math.rsqrt %98 : vector<16x1xf32>
    %100 = vector.broadcast %99 : vector<16x1xf32> to vector<16x64xf32>
    %101 = arith.mulf %96, %100 : vector<16x64xf32>
    %102 = vector.broadcast %9 : vector<1x64xf32> to vector<16x64xf32>
    %103 = arith.mulf %101, %102 : vector<16x64xf32>
    %104 = vector.broadcast %10 : vector<1x64xf32> to vector<16x64xf32>
    %105 = arith.addf %103, %104 : vector<16x64xf32>
    %cst_96 = arith.constant 2.000000e+01 : f32
    %106 = vector.broadcast %cst_96 : f32 to vector<16x64xf32>
    %107 = arith.minimumf %105, %106 : vector<16x64xf32>
    %108 = math.exp %107 : vector<16x64xf32>
    %cst_97 = arith.constant 2.000000e+00 : f32
    %109 = vector.broadcast %cst_97 : f32 to vector<16x64xf32>
    %110 = arith.addf %108, %109 : vector<16x64xf32>
    %111 = arith.mulf %108, %110 : vector<16x64xf32>
    %cst_98 = arith.constant 2.000000e+01 : f32
    %112 = vector.broadcast %cst_98 : f32 to vector<16x64xf32>
    %113 = arith.cmpf ogt, %105, %112 : vector<16x64xf32>
    %114 = arith.mulf %105, %111 : vector<16x64xf32>
    %cst_99 = arith.constant 2.000000e+00 : f32
    %115 = vector.broadcast %cst_99 : f32 to vector<16x64xf32>
    %116 = arith.addf %111, %115 : vector<16x64xf32>
    %117 = arith.divf %114, %116 : vector<16x64xf32>
    %118 = arith.select %113, %105, %117 : vector<16x64xi1>, vector<16x64xf32>
    %119 = arith.truncf %118 : vector<16x64xf32> to vector<16x64xbf16>
    %cst_100 = arith.constant dense<0.000000e+00> : vector<16x32xf32>
    %120 = tpu.matmul %119, %11, %cst_100 {dimension_numbers = #tpu.dot_dimension_numbers<[1], [0], [0], [1], [0, 0, 1, 1], [], []>} : vector<16x64xbf16>, vector<64x32xbf16>, vector<16x32xf32> -> vector<16x32xf32>
    %121 = vector.broadcast %12 : vector<1x32xf32> to vector<16x32xf32>
    %122 = arith.addf %120, %121 : vector<16x32xf32>
    %123 = arith.truncf %1 : vector<16x32xf32> to vector<16x32xbf16>
    %cst_101 = arith.constant dense<0.000000e+00> : vector<16x64xf32>
    %124 = tpu.matmul %123, %13, %cst_101 {dimension_numbers = #tpu.dot_dimension_numbers<[1], [0], [0], [1], [0, 0, 1, 1], [], []>} : vector<16x32xbf16>, vector<32x64xbf16>, vector<16x64xf32> -> vector<16x64xf32>
    %125 = vector.broadcast %14 : vector<1x64xf32> to vector<16x64xf32>
    %126 = arith.addf %124, %125 : vector<16x64xf32>
    %cst_102 = arith.constant dense<0.000000e+00> : vector<16xf32>
    %127 = vector.multi_reduction <add>, %126, %cst_102 [1] : vector<16x64xf32> to vector<16xf32>
    %128 = vector.shape_cast %127 : vector<16xf32> to vector<16x1xf32>
    %cst_103 = arith.constant 6.400000e+01 : f32
    %129 = vector.broadcast %cst_103 : f32 to vector<16x1xf32>
    %130 = arith.divf %128, %129 : vector<16x1xf32>
    %131 = vector.broadcast %130 : vector<16x1xf32> to vector<16x64xf32>
    %132 = arith.subf %126, %131 : vector<16x64xf32>
    %133 = arith.mulf %132, %132 : vector<16x64xf32>
    %cst_104 = arith.constant dense<0.000000e+00> : vector<16xf32>
    %134 = vector.multi_reduction <add>, %133, %cst_104 [1] : vector<16x64xf32> to vector<16xf32>
    %135 = vector.shape_cast %134 : vector<16xf32> to vector<16x1xf32>
    %cst_105 = arith.constant 6.400000e+01 : f32
    %136 = vector.broadcast %cst_105 : f32 to vector<16x1xf32>
    %137 = arith.divf %135, %136 : vector<16x1xf32>
    %138 = vector.broadcast %130 : vector<16x1xf32> to vector<16x64xf32>
    %139 = arith.subf %126, %138 : vector<16x64xf32>
    %cst_106 = arith.constant 9.99999974E-6 : f32
    %140 = vector.broadcast %cst_106 : f32 to vector<16x1xf32>
    %141 = arith.addf %137, %140 : vector<16x1xf32>
    %142 = math.rsqrt %141 : vector<16x1xf32>
    %143 = vector.broadcast %142 : vector<16x1xf32> to vector<16x64xf32>
    %144 = arith.mulf %139, %143 : vector<16x64xf32>
    %145 = vector.broadcast %15 : vector<1x64xf32> to vector<16x64xf32>
    %146 = arith.mulf %144, %145 : vector<16x64xf32>
    %147 = vector.broadcast %16 : vector<1x64xf32> to vector<16x64xf32>
    %148 = arith.addf %146, %147 : vector<16x64xf32>
    %cst_107 = arith.constant 2.000000e+01 : f32
    %149 = vector.broadcast %cst_107 : f32 to vector<16x64xf32>
    %150 = arith.minimumf %148, %149 : vector<16x64xf32>
    %151 = math.exp %150 : vector<16x64xf32>
    %cst_108 = arith.constant 2.000000e+00 : f32
    %152 = vector.broadcast %cst_108 : f32 to vector<16x64xf32>
    %153 = arith.addf %151, %152 : vector<16x64xf32>
    %154 = arith.mulf %151, %153 : vector<16x64xf32>
    %cst_109 = arith.constant 2.000000e+01 : f32
    %155 = vector.broadcast %cst_109 : f32 to vector<16x64xf32>
    %156 = arith.cmpf ogt, %148, %155 : vector<16x64xf32>
    %157 = arith.mulf %148, %154 : vector<16x64xf32>
    %cst_110 = arith.constant 2.000000e+00 : f32
    %158 = vector.broadcast %cst_110 : f32 to vector<16x64xf32>
    %159 = arith.addf %154, %158 : vector<16x64xf32>
    %160 = arith.divf %157, %159 : vector<16x64xf32>
    %161 = arith.select %156, %148, %160 : vector<16x64xi1>, vector<16x64xf32>
    %162 = arith.truncf %161 : vector<16x64xf32> to vector<16x64xbf16>
    %cst_111 = arith.constant dense<0.000000e+00> : vector<16x64xf32>
    %163 = tpu.matmul %162, %17, %cst_111 {dimension_numbers = #tpu.dot_dimension_numbers<[1], [0], [0], [1], [0, 0, 1, 1], [], []>} : vector<16x64xbf16>, vector<64x64xbf16>, vector<16x64xf32> -> vector<16x64xf32>
    %164 = vector.broadcast %18 : vector<1x64xf32> to vector<16x64xf32>
    %165 = arith.addf %163, %164 : vector<16x64xf32>
    %cst_112 = arith.constant dense<0.000000e+00> : vector<16xf32>
    %166 = vector.multi_reduction <add>, %165, %cst_112 [1] : vector<16x64xf32> to vector<16xf32>
    %167 = vector.shape_cast %166 : vector<16xf32> to vector<16x1xf32>
    %cst_113 = arith.constant 6.400000e+01 : f32
    %168 = vector.broadcast %cst_113 : f32 to vector<16x1xf32>
    %169 = arith.divf %167, %168 : vector<16x1xf32>
    %170 = vector.broadcast %169 : vector<16x1xf32> to vector<16x64xf32>
    %171 = arith.subf %165, %170 : vector<16x64xf32>
    %172 = arith.mulf %171, %171 : vector<16x64xf32>
    %cst_114 = arith.constant dense<0.000000e+00> : vector<16xf32>
    %173 = vector.multi_reduction <add>, %172, %cst_114 [1] : vector<16x64xf32> to vector<16xf32>
    %174 = vector.shape_cast %173 : vector<16xf32> to vector<16x1xf32>
    %cst_115 = arith.constant 6.400000e+01 : f32
    %175 = vector.broadcast %cst_115 : f32 to vector<16x1xf32>
    %176 = arith.divf %174, %175 : vector<16x1xf32>
    %177 = vector.broadcast %169 : vector<16x1xf32> to vector<16x64xf32>
    %178 = arith.subf %165, %177 : vector<16x64xf32>
    %cst_116 = arith.constant 9.99999974E-6 : f32
    %179 = vector.broadcast %cst_116 : f32 to vector<16x1xf32>
    %180 = arith.addf %176, %179 : vector<16x1xf32>
    %181 = math.rsqrt %180 : vector<16x1xf32>
    %182 = vector.broadcast %181 : vector<16x1xf32> to vector<16x64xf32>
    %183 = arith.mulf %178, %182 : vector<16x64xf32>
    %184 = vector.broadcast %19 : vector<1x64xf32> to vector<16x64xf32>
    %185 = arith.mulf %183, %184 : vector<16x64xf32>
    %186 = vector.broadcast %20 : vector<1x64xf32> to vector<16x64xf32>
    %187 = arith.addf %185, %186 : vector<16x64xf32>
    %cst_117 = arith.constant 2.000000e+01 : f32
    %188 = vector.broadcast %cst_117 : f32 to vector<16x64xf32>
    %189 = arith.minimumf %187, %188 : vector<16x64xf32>
    %190 = math.exp %189 : vector<16x64xf32>
    %cst_118 = arith.constant 2.000000e+00 : f32
    %191 = vector.broadcast %cst_118 : f32 to vector<16x64xf32>
    %192 = arith.addf %190, %191 : vector<16x64xf32>
    %193 = arith.mulf %190, %192 : vector<16x64xf32>
    %cst_119 = arith.constant 2.000000e+01 : f32
    %194 = vector.broadcast %cst_119 : f32 to vector<16x64xf32>
    %195 = arith.cmpf ogt, %187, %194 : vector<16x64xf32>
    %196 = arith.mulf %187, %193 : vector<16x64xf32>
    %cst_120 = arith.constant 2.000000e+00 : f32
    %197 = vector.broadcast %cst_120 : f32 to vector<16x64xf32>
    %198 = arith.addf %193, %197 : vector<16x64xf32>
    %199 = arith.divf %196, %198 : vector<16x64xf32>
    %200 = arith.select %195, %187, %199 : vector<16x64xi1>, vector<16x64xf32>
    %201 = arith.truncf %200 : vector<16x64xf32> to vector<16x64xbf16>
    %cst_121 = arith.constant dense<0.000000e+00> : vector<16x32xf32>
    %202 = tpu.matmul %201, %21, %cst_121 {dimension_numbers = #tpu.dot_dimension_numbers<[1], [0], [0], [1], [0, 0, 1, 1], [], []>} : vector<16x64xbf16>, vector<64x32xbf16>, vector<16x32xf32> -> vector<16x32xf32>
    %203 = vector.broadcast %22 : vector<1x32xf32> to vector<16x32xf32>
    %204 = arith.addf %202, %203 : vector<16x32xf32>
    %205 = arith.truncf %2 : vector<16x32xf32> to vector<16x32xbf16>
    %cst_122 = arith.constant dense<0.000000e+00> : vector<16x64xf32>
    %206 = tpu.matmul %205, %23, %cst_122 {dimension_numbers = #tpu.dot_dimension_numbers<[1], [0], [0], [1], [0, 0, 1, 1], [], []>} : vector<16x32xbf16>, vector<32x64xbf16>, vector<16x64xf32> -> vector<16x64xf32>
    %207 = vector.broadcast %24 : vector<1x64xf32> to vector<16x64xf32>
    %208 = arith.addf %206, %207 : vector<16x64xf32>
    %cst_123 = arith.constant dense<0.000000e+00> : vector<16xf32>
    %209 = vector.multi_reduction <add>, %208, %cst_123 [1] : vector<16x64xf32> to vector<16xf32>
    %210 = vector.shape_cast %209 : vector<16xf32> to vector<16x1xf32>
    %cst_124 = arith.constant 6.400000e+01 : f32
    %211 = vector.broadcast %cst_124 : f32 to vector<16x1xf32>
    %212 = arith.divf %210, %211 : vector<16x1xf32>
    %213 = vector.broadcast %212 : vector<16x1xf32> to vector<16x64xf32>
    %214 = arith.subf %208, %213 : vector<16x64xf32>
    %215 = arith.mulf %214, %214 : vector<16x64xf32>
    %cst_125 = arith.constant dense<0.000000e+00> : vector<16xf32>
    %216 = vector.multi_reduction <add>, %215, %cst_125 [1] : vector<16x64xf32> to vector<16xf32>
    %217 = vector.shape_cast %216 : vector<16xf32> to vector<16x1xf32>
    %cst_126 = arith.constant 6.400000e+01 : f32
    %218 = vector.broadcast %cst_126 : f32 to vector<16x1xf32>
    %219 = arith.divf %217, %218 : vector<16x1xf32>
    %220 = vector.broadcast %212 : vector<16x1xf32> to vector<16x64xf32>
    %221 = arith.subf %208, %220 : vector<16x64xf32>
    %cst_127 = arith.constant 9.99999974E-6 : f32
    %222 = vector.broadcast %cst_127 : f32 to vector<16x1xf32>
    %223 = arith.addf %219, %222 : vector<16x1xf32>
    %224 = math.rsqrt %223 : vector<16x1xf32>
    %225 = vector.broadcast %224 : vector<16x1xf32> to vector<16x64xf32>
    %226 = arith.mulf %221, %225 : vector<16x64xf32>
    %227 = vector.broadcast %25 : vector<1x64xf32> to vector<16x64xf32>
    %228 = arith.mulf %226, %227 : vector<16x64xf32>
    %229 = vector.broadcast %26 : vector<1x64xf32> to vector<16x64xf32>
    %230 = arith.addf %228, %229 : vector<16x64xf32>
    %cst_128 = arith.constant 2.000000e+01 : f32
    %231 = vector.broadcast %cst_128 : f32 to vector<16x64xf32>
    %232 = arith.minimumf %230, %231 : vector<16x64xf32>
    %233 = math.exp %232 : vector<16x64xf32>
    %cst_129 = arith.constant 2.000000e+00 : f32
    %234 = vector.broadcast %cst_129 : f32 to vector<16x64xf32>
    %235 = arith.addf %233, %234 : vector<16x64xf32>
    %236 = arith.mulf %233, %235 : vector<16x64xf32>
    %cst_130 = arith.constant 2.000000e+01 : f32
    %237 = vector.broadcast %cst_130 : f32 to vector<16x64xf32>
    %238 = arith.cmpf ogt, %230, %237 : vector<16x64xf32>
    %239 = arith.mulf %230, %236 : vector<16x64xf32>
    %cst_131 = arith.constant 2.000000e+00 : f32
    %240 = vector.broadcast %cst_131 : f32 to vector<16x64xf32>
    %241 = arith.addf %236, %240 : vector<16x64xf32>
    %242 = arith.divf %239, %241 : vector<16x64xf32>
    %243 = arith.select %238, %230, %242 : vector<16x64xi1>, vector<16x64xf32>
    %244 = arith.truncf %243 : vector<16x64xf32> to vector<16x64xbf16>
    %cst_132 = arith.constant dense<0.000000e+00> : vector<16x64xf32>
    %245 = tpu.matmul %244, %27, %cst_132 {dimension_numbers = #tpu.dot_dimension_numbers<[1], [0], [0], [1], [0, 0, 1, 1], [], []>} : vector<16x64xbf16>, vector<64x64xbf16>, vector<16x64xf32> -> vector<16x64xf32>
    %246 = vector.broadcast %28 : vector<1x64xf32> to vector<16x64xf32>
    %247 = arith.addf %245, %246 : vector<16x64xf32>
    %cst_133 = arith.constant dense<0.000000e+00> : vector<16xf32>
    %248 = vector.multi_reduction <add>, %247, %cst_133 [1] : vector<16x64xf32> to vector<16xf32>
    %249 = vector.shape_cast %248 : vector<16xf32> to vector<16x1xf32>
    %cst_134 = arith.constant 6.400000e+01 : f32
    %250 = vector.broadcast %cst_134 : f32 to vector<16x1xf32>
    %251 = arith.divf %249, %250 : vector<16x1xf32>
    %252 = vector.broadcast %251 : vector<16x1xf32> to vector<16x64xf32>
    %253 = arith.subf %247, %252 : vector<16x64xf32>
    %254 = arith.mulf %253, %253 : vector<16x64xf32>
    %cst_135 = arith.constant dense<0.000000e+00> : vector<16xf32>
    %255 = vector.multi_reduction <add>, %254, %cst_135 [1] : vector<16x64xf32> to vector<16xf32>
    %256 = vector.shape_cast %255 : vector<16xf32> to vector<16x1xf32>
    %cst_136 = arith.constant 6.400000e+01 : f32
    %257 = vector.broadcast %cst_136 : f32 to vector<16x1xf32>
    %258 = arith.divf %256, %257 : vector<16x1xf32>
    %259 = vector.broadcast %251 : vector<16x1xf32> to vector<16x64xf32>
    %260 = arith.subf %247, %259 : vector<16x64xf32>
    %cst_137 = arith.constant 9.99999974E-6 : f32
    %261 = vector.broadcast %cst_137 : f32 to vector<16x1xf32>
    %262 = arith.addf %258, %261 : vector<16x1xf32>
    %263 = math.rsqrt %262 : vector<16x1xf32>
    %264 = vector.broadcast %263 : vector<16x1xf32> to vector<16x64xf32>
    %265 = arith.mulf %260, %264 : vector<16x64xf32>
    %266 = vector.broadcast %29 : vector<1x64xf32> to vector<16x64xf32>
    %267 = arith.mulf %265, %266 : vector<16x64xf32>
    %268 = vector.broadcast %30 : vector<1x64xf32> to vector<16x64xf32>
    %269 = arith.addf %267, %268 : vector<16x64xf32>
    %cst_138 = arith.constant 2.000000e+01 : f32
    %270 = vector.broadcast %cst_138 : f32 to vector<16x64xf32>
    %271 = arith.minimumf %269, %270 : vector<16x64xf32>
    %272 = math.exp %271 : vector<16x64xf32>
    %cst_139 = arith.constant 2.000000e+00 : f32
    %273 = vector.broadcast %cst_139 : f32 to vector<16x64xf32>
    %274 = arith.addf %272, %273 : vector<16x64xf32>
    %275 = arith.mulf %272, %274 : vector<16x64xf32>
    %cst_140 = arith.constant 2.000000e+01 : f32
    %276 = vector.broadcast %cst_140 : f32 to vector<16x64xf32>
    %277 = arith.cmpf ogt, %269, %276 : vector<16x64xf32>
    %278 = arith.mulf %269, %275 : vector<16x64xf32>
    %cst_141 = arith.constant 2.000000e+00 : f32
    %279 = vector.broadcast %cst_141 : f32 to vector<16x64xf32>
    %280 = arith.addf %275, %279 : vector<16x64xf32>
    %281 = arith.divf %278, %280 : vector<16x64xf32>
    %282 = arith.select %277, %269, %281 : vector<16x64xi1>, vector<16x64xf32>
    %283 = arith.truncf %282 : vector<16x64xf32> to vector<16x64xbf16>
    %cst_142 = arith.constant dense<0.000000e+00> : vector<16x32xf32>
    %284 = tpu.matmul %283, %31, %cst_142 {dimension_numbers = #tpu.dot_dimension_numbers<[1], [0], [0], [1], [0, 0, 1, 1], [], []>} : vector<16x64xbf16>, vector<64x32xbf16>, vector<16x32xf32> -> vector<16x32xf32>
    %285 = vector.broadcast %32 : vector<1x32xf32> to vector<16x32xf32>
    %286 = arith.addf %284, %285 : vector<16x32xf32>
    %287 = arith.truncf %122 : vector<16x32xf32> to vector<16x32xbf16>
    %cst_143 = arith.constant dense<0.000000e+00> : vector<16x128xf32>
    %288 = tpu.matmul %287, %33, %cst_143 {dimension_numbers = #tpu.dot_dimension_numbers<[1], [0], [0], [1], [0, 0, 1, 1], [], []>} : vector<16x32xbf16>, vector<32x128xbf16>, vector<16x128xf32> -> vector<16x128xf32>
    %289 = arith.truncf %204 : vector<16x32xf32> to vector<16x32xbf16>
    %cst_144 = arith.constant dense<0.000000e+00> : vector<16x128xf32>
    %290 = tpu.matmul %289, %34, %cst_144 {dimension_numbers = #tpu.dot_dimension_numbers<[1], [0], [0], [1], [0, 0, 1, 1], [], []>} : vector<16x32xbf16>, vector<32x128xbf16>, vector<16x128xf32> -> vector<16x128xf32>
    %291 = arith.addf %288, %290 : vector<16x128xf32>
    %292 = arith.truncf %286 : vector<16x32xf32> to vector<16x32xbf16>
    %cst_145 = arith.constant dense<0.000000e+00> : vector<16x128xf32>
    %293 = tpu.matmul %292, %35, %cst_145 {dimension_numbers = #tpu.dot_dimension_numbers<[1], [0], [0], [1], [0, 0, 1, 1], [], []>} : vector<16x32xbf16>, vector<32x128xbf16>, vector<16x128xf32> -> vector<16x128xf32>
    %294 = arith.addf %291, %293 : vector<16x128xf32>
    %295 = vector.broadcast %36 : vector<1x128xf32> to vector<16x128xf32>
    %296 = arith.addf %294, %295 : vector<16x128xf32>
    %297 = tpu.iota {dimensions = array<i32: 1>} : vector<16x128xi32>
    %c64_i32 = arith.constant 64 : i32
    %298 = vector.broadcast %c64_i32 : i32 to vector<16x128xi32>
    %299 = arith.cmpi slt, %297, %298 : vector<16x128xi32>
    %cst_146 = arith.constant 0.000000e+00 : f32
    %300 = vector.broadcast %cst_146 : f32 to vector<16x128xf32>
    %301 = arith.select %299, %296, %300 : vector<16x128xi1>, vector<16x128xf32>
    %cst_147 = arith.constant dense<0.000000e+00> : vector<16xf32>
    %302 = vector.multi_reduction <add>, %301, %cst_147 [1] : vector<16x128xf32> to vector<16xf32>
    %303 = vector.shape_cast %302 : vector<16xf32> to vector<16x1xf32>
    %cst_148 = arith.constant 1.562500e-02 : f32
    %304 = vector.broadcast %cst_148 : f32 to vector<16x1xf32>
    %305 = arith.mulf %303, %304 : vector<16x1xf32>
    %cst_149 = arith.constant 0.000000e+00 : f32
    %306 = vector.broadcast %cst_149 : f32 to vector<16x128xf32>
    %307 = arith.select %299, %306, %296 : vector<16x128xi1>, vector<16x128xf32>
    %cst_150 = arith.constant dense<0.000000e+00> : vector<16xf32>
    %308 = vector.multi_reduction <add>, %307, %cst_150 [1] : vector<16x128xf32> to vector<16xf32>
    %309 = vector.shape_cast %308 : vector<16xf32> to vector<16x1xf32>
    %cst_151 = arith.constant 1.562500e-02 : f32
    %310 = vector.broadcast %cst_151 : f32 to vector<16x1xf32>
    %311 = arith.mulf %309, %310 : vector<16x1xf32>
    %312 = vector.shape_cast %305 : vector<16x1xf32> to vector<16x1xf32>
    %313 = vector.broadcast %312 : vector<16x1xf32> to vector<16x128xf32>
    %314 = vector.shape_cast %311 : vector<16x1xf32> to vector<16x1xf32>
    %315 = vector.broadcast %314 : vector<16x1xf32> to vector<16x128xf32>
    %316 = arith.select %299, %313, %315 : vector<16x128xi1>, vector<16x128xf32>
    %317 = arith.subf %296, %316 : vector<16x128xf32>
    %318 = arith.mulf %317, %317 : vector<16x128xf32>
    %cst_152 = arith.constant 0.000000e+00 : f32
    %319 = vector.broadcast %cst_152 : f32 to vector<16x128xf32>
    %320 = arith.select %299, %318, %319 : vector<16x128xi1>, vector<16x128xf32>
    %cst_153 = arith.constant dense<0.000000e+00> : vector<16xf32>
    %321 = vector.multi_reduction <add>, %320, %cst_153 [1] : vector<16x128xf32> to vector<16xf32>
    %322 = vector.shape_cast %321 : vector<16xf32> to vector<16x1xf32>
    %cst_154 = arith.constant 1.562500e-02 : f32
    %323 = vector.broadcast %cst_154 : f32 to vector<16x1xf32>
    %324 = arith.mulf %322, %323 : vector<16x1xf32>
    %cst_155 = arith.constant 0.000000e+00 : f32
    %325 = vector.broadcast %cst_155 : f32 to vector<16x128xf32>
    %326 = arith.select %299, %325, %318 : vector<16x128xi1>, vector<16x128xf32>
    %cst_156 = arith.constant dense<0.000000e+00> : vector<16xf32>
    %327 = vector.multi_reduction <add>, %326, %cst_156 [1] : vector<16x128xf32> to vector<16xf32>
    %328 = vector.shape_cast %327 : vector<16xf32> to vector<16x1xf32>
    %cst_157 = arith.constant 1.562500e-02 : f32
    %329 = vector.broadcast %cst_157 : f32 to vector<16x1xf32>
    %330 = arith.mulf %328, %329 : vector<16x1xf32>
    %331 = vector.shape_cast %324 : vector<16x1xf32> to vector<16x1xf32>
    %332 = vector.broadcast %331 : vector<16x1xf32> to vector<16x128xf32>
    %333 = vector.shape_cast %330 : vector<16x1xf32> to vector<16x1xf32>
    %334 = vector.broadcast %333 : vector<16x1xf32> to vector<16x128xf32>
    %335 = arith.select %299, %332, %334 : vector<16x128xi1>, vector<16x128xf32>
    %cst_158 = arith.constant 9.99999974E-6 : f32
    %336 = vector.broadcast %cst_158 : f32 to vector<16x128xf32>
    %337 = arith.addf %335, %336 : vector<16x128xf32>
    %338 = math.rsqrt %337 : vector<16x128xf32>
    %339 = arith.mulf %317, %338 : vector<16x128xf32>
    %340 = vector.broadcast %37 : vector<1x128xf32> to vector<16x128xf32>
    %341 = arith.mulf %339, %340 : vector<16x128xf32>
    %342 = vector.broadcast %38 : vector<1x128xf32> to vector<16x128xf32>
    %343 = arith.addf %341, %342 : vector<16x128xf32>
    %cst_159 = arith.constant 2.000000e+01 : f32
    %344 = vector.broadcast %cst_159 : f32 to vector<16x128xf32>
    %345 = arith.minimumf %343, %344 : vector<16x128xf32>
    %346 = math.exp %345 : vector<16x128xf32>
    %cst_160 = arith.constant 2.000000e+00 : f32
    %347 = vector.broadcast %cst_160 : f32 to vector<16x128xf32>
    %348 = arith.addf %346, %347 : vector<16x128xf32>
    %349 = arith.mulf %346, %348 : vector<16x128xf32>
    %cst_161 = arith.constant 2.000000e+01 : f32
    %350 = vector.broadcast %cst_161 : f32 to vector<16x128xf32>
    %351 = arith.cmpf ogt, %343, %350 : vector<16x128xf32>
    %352 = arith.mulf %343, %349 : vector<16x128xf32>
    %cst_162 = arith.constant 2.000000e+00 : f32
    %353 = vector.broadcast %cst_162 : f32 to vector<16x128xf32>
    %354 = arith.addf %349, %353 : vector<16x128xf32>
    %355 = arith.divf %352, %354 : vector<16x128xf32>
    %356 = arith.select %351, %343, %355 : vector<16x128xi1>, vector<16x128xf32>
    %357 = arith.truncf %356 : vector<16x128xf32> to vector<16x128xbf16>
    %cst_163 = arith.constant dense<0.000000e+00> : vector<16x16xf32>
    %358 = tpu.matmul %357, %39, %cst_163 {dimension_numbers = #tpu.dot_dimension_numbers<[1], [0], [0], [1], [0, 0, 1, 1], [], []>} : vector<16x128xbf16>, vector<128x16xbf16>, vector<16x16xf32> -> vector<16x16xf32>
    %359 = vector.broadcast %40 : vector<1x16xf32> to vector<16x16xf32>
    %360 = arith.addf %358, %359 : vector<16x16xf32>
    %c0_164 = arith.constant 0 : index
    %c0_165 = arith.constant 0 : index
    %361 = vector.load %arg42[%c0_164, %c0_165] : memref<16x16xf32, #tpu.memory_space<vmem>>, vector<16x16xf32>
    tpu.vector_store %arg42[%c0_164, %c0_165], %360 {strides = array<i32>} : memref<16x16xf32, #tpu.memory_space<vmem>>, vector<16x16xf32>,
    return
  }
  func.func @transform_0(%arg0: i32) -> (i32, i32) {
    %c0_i32 = arith.constant 0 : i32
    %c0_i32_0 = arith.constant 0 : i32
    return %arg0, %c0_i32 : i32, i32
  }
  func.func @transform_1(%arg0: i32) -> (i32, i32) {
    %c0_i32 = arith.constant 0 : i32
    %c0_i32_0 = arith.constant 0 : i32
    return %arg0, %c0_i32 : i32, i32
  }
  func.func @transform_2(%arg0: i32) -> (i32, i32) {
    %c0_i32 = arith.constant 0 : i32
    %c0_i32_0 = arith.constant 0 : i32
    return %arg0, %c0_i32 : i32, i32
  }
  func.func @transform_3(%arg0: i32) -> (i32, i32) {
    %c0_i32 = arith.constant 0 : i32
    %c0_i32_0 = arith.constant 0 : i32
    %c0_i32_1 = arith.constant 0 : i32
    return %c0_i32, %c0_i32_0 : i32, i32
  }
  func.func @transform_4(%arg0: i32) -> (i32, i32) {
    %c0_i32 = arith.constant 0 : i32
    %c0_i32_0 = arith.constant 0 : i32
    %c0_i32_1 = arith.constant 0 : i32
    return %c0_i32, %c0_i32_0 : i32, i32
  }
  func.func @transform_5(%arg0: i32) -> (i32, i32) {
    %c0_i32 = arith.constant 0 : i32
    %c0_i32_0 = arith.constant 0 : i32
    %c0_i32_1 = arith.constant 0 : i32
    return %c0_i32, %c0_i32_0 : i32, i32
  }
  func.func @transform_6(%arg0: i32) -> (i32, i32) {
    %c0_i32 = arith.constant 0 : i32
    %c0_i32_0 = arith.constant 0 : i32
    %c0_i32_1 = arith.constant 0 : i32
    return %c0_i32, %c0_i32_0 : i32, i32
  }
  func.func @transform_7(%arg0: i32) -> (i32, i32) {
    %c0_i32 = arith.constant 0 : i32
    %c0_i32_0 = arith.constant 0 : i32
    %c0_i32_1 = arith.constant 0 : i32
    return %c0_i32, %c0_i32_0 : i32, i32
  }
  func.func @transform_8(%arg0: i32) -> (i32, i32) {
    %c0_i32 = arith.constant 0 : i32
    %c0_i32_0 = arith.constant 0 : i32
    %c0_i32_1 = arith.constant 0 : i32
    return %c0_i32, %c0_i32_0 : i32, i32
  }
  func.func @transform_9(%arg0: i32) -> (i32, i32) {
    %c0_i32 = arith.constant 0 : i32
    %c0_i32_0 = arith.constant 0 : i32
    %c0_i32_1 = arith.constant 0 : i32
    return %c0_i32, %c0_i32_0 : i32, i32
  }
  func.func @transform_10(%arg0: i32) -> (i32, i32) {
    %c0_i32 = arith.constant 0 : i32
    %c0_i32_0 = arith.constant 0 : i32
    %c0_i32_1 = arith.constant 0 : i32
    return %c0_i32, %c0_i32_0 : i32, i32
  }
  func.func @transform_11(%arg0: i32) -> (i32, i32) {
    %c0_i32 = arith.constant 0 : i32
    %c0_i32_0 = arith.constant 0 : i32
    %c0_i32_1 = arith.constant 0 : i32
    return %c0_i32, %c0_i32_0 : i32, i32
  }
  func.func @transform_12(%arg0: i32) -> (i32, i32) {
    %c0_i32 = arith.constant 0 : i32
    %c0_i32_0 = arith.constant 0 : i32
    %c0_i32_1 = arith.constant 0 : i32
    return %c0_i32, %c0_i32_0 : i32, i32
  }
  func.func @transform_13(%arg0: i32) -> (i32, i32) {
    %c0_i32 = arith.constant 0 : i32
    %c0_i32_0 = arith.constant 0 : i32
    %c0_i32_1 = arith.constant 0 : i32
    return %c0_i32, %c0_i32_0 : i32, i32
  }
  func.func @transform_14(%arg0: i32) -> (i32, i32) {
    %c0_i32 = arith.constant 0 : i32
    %c0_i32_0 = arith.constant 0 : i32
    %c0_i32_1 = arith.constant 0 : i32
    return %c0_i32, %c0_i32_0 : i32, i32
  }
  func.func @transform_15(%arg0: i32) -> (i32, i32) {
    %c0_i32 = arith.constant 0 : i32
    %c0_i32_0 = arith.constant 0 : i32
    %c0_i32_1 = arith.constant 0 : i32
    return %c0_i32, %c0_i32_0 : i32, i32
  }
  func.func @transform_16(%arg0: i32) -> (i32, i32) {
    %c0_i32 = arith.constant 0 : i32
    %c0_i32_0 = arith.constant 0 : i32
    %c0_i32_1 = arith.constant 0 : i32
    return %c0_i32, %c0_i32_0 : i32, i32
  }
  func.func @transform_17(%arg0: i32) -> (i32, i32) {
    %c0_i32 = arith.constant 0 : i32
    %c0_i32_0 = arith.constant 0 : i32
    %c0_i32_1 = arith.constant 0 : i32
    return %c0_i32, %c0_i32_0 : i32, i32
  }
  func.func @transform_18(%arg0: i32) -> (i32, i32) {
    %c0_i32 = arith.constant 0 : i32
    %c0_i32_0 = arith.constant 0 : i32
    %c0_i32_1 = arith.constant 0 : i32
    return %c0_i32, %c0_i32_0 : i32, i32
  }
  func.func @transform_19(%arg0: i32) -> (i32, i32) {
    %c0_i32 = arith.constant 0 : i32
    %c0_i32_0 = arith.constant 0 : i32
    %c0_i32_1 = arith.constant 0 : i32
    return %c0_i32, %c0_i32_0 : i32, i32
  }
  func.func @transform_20(%arg0: i32) -> (i32, i32) {
    %c0_i32 = arith.constant 0 : i32
    %c0_i32_0 = arith.constant 0 : i32
    %c0_i32_1 = arith.constant 0 : i32
    return %c0_i32, %c0_i32_0 : i32, i32
  }
  func.func @transform_21(%arg0: i32) -> (i32, i32) {
    %c0_i32 = arith.constant 0 : i32
    %c0_i32_0 = arith.constant 0 : i32
    %c0_i32_1 = arith.constant 0 : i32
    return %c0_i32, %c0_i32_0 : i32, i32
  }
  func.func @transform_22(%arg0: i32) -> (i32, i32) {
    %c0_i32 = arith.constant 0 : i32
    %c0_i32_0 = arith.constant 0 : i32
    %c0_i32_1 = arith.constant 0 : i32
    return %c0_i32, %c0_i32_0 : i32, i32
  }
  func.func @transform_23(%arg0: i32) -> (i32, i32) {
    %c0_i32 = arith.constant 0 : i32
    %c0_i32_0 = arith.constant 0 : i32
    %c0_i32_1 = arith.constant 0 : i32
    return %c0_i32, %c0_i32_0 : i32, i32
  }
  func.func @transform_24(%arg0: i32) -> (i32, i32) {
    %c0_i32 = arith.constant 0 : i32
    %c0_i32_0 = arith.constant 0 : i32
    %c0_i32_1 = arith.constant 0 : i32
    return %c0_i32, %c0_i32_0 : i32, i32
  }
  func.func @transform_25(%arg0: i32) -> (i32, i32) {
    %c0_i32 = arith.constant 0 : i32
    %c0_i32_0 = arith.constant 0 : i32
    %c0_i32_1 = arith.constant 0 : i32
    return %c0_i32, %c0_i32_0 : i32, i32
  }
  func.func @transform_26(%arg0: i32) -> (i32, i32) {
    %c0_i32 = arith.constant 0 : i32
    %c0_i32_0 = arith.constant 0 : i32
    %c0_i32_1 = arith.constant 0 : i32
    return %c0_i32, %c0_i32_0 : i32, i32
  }
  func.func @transform_27(%arg0: i32) -> (i32, i32) {
    %c0_i32 = arith.constant 0 : i32
    %c0_i32_0 = arith.constant 0 : i32
    %c0_i32_1 = arith.constant 0 : i32
    return %c0_i32, %c0_i32_0 : i32, i32
  }
  func.func @transform_28(%arg0: i32) -> (i32, i32) {
    %c0_i32 = arith.constant 0 : i32
    %c0_i32_0 = arith.constant 0 : i32
    %c0_i32_1 = arith.constant 0 : i32
    return %c0_i32, %c0_i32_0 : i32, i32
  }
  func.func @transform_29(%arg0: i32) -> (i32, i32) {
    %c0_i32 = arith.constant 0 : i32
    %c0_i32_0 = arith.constant 0 : i32
    %c0_i32_1 = arith.constant 0 : i32
    return %c0_i32, %c0_i32_0 : i32, i32
  }
  func.func @transform_30(%arg0: i32) -> (i32, i32) {
    %c0_i32 = arith.constant 0 : i32
    %c0_i32_0 = arith.constant 0 : i32
    %c0_i32_1 = arith.constant 0 : i32
    return %c0_i32, %c0_i32_0 : i32, i32
  }
  func.func @transform_31(%arg0: i32) -> (i32, i32) {
    %c0_i32 = arith.constant 0 : i32
    %c0_i32_0 = arith.constant 0 : i32
    %c0_i32_1 = arith.constant 0 : i32
    return %c0_i32, %c0_i32_0 : i32, i32
  }
  func.func @transform_32(%arg0: i32) -> (i32, i32) {
    %c0_i32 = arith.constant 0 : i32
    %c0_i32_0 = arith.constant 0 : i32
    %c0_i32_1 = arith.constant 0 : i32
    return %c0_i32, %c0_i32_0 : i32, i32
  }
  func.func @transform_33(%arg0: i32) -> (i32, i32) {
    %c0_i32 = arith.constant 0 : i32
    %c0_i32_0 = arith.constant 0 : i32
    %c0_i32_1 = arith.constant 0 : i32
    return %c0_i32, %c0_i32_0 : i32, i32
  }
  func.func @transform_34(%arg0: i32) -> (i32, i32) {
    %c0_i32 = arith.constant 0 : i32
    %c0_i32_0 = arith.constant 0 : i32
    %c0_i32_1 = arith.constant 0 : i32
    return %c0_i32, %c0_i32_0 : i32, i32
  }
  func.func @transform_35(%arg0: i32) -> (i32, i32) {
    %c0_i32 = arith.constant 0 : i32
    %c0_i32_0 = arith.constant 0 : i32
    %c0_i32_1 = arith.constant 0 : i32
    return %c0_i32, %c0_i32_0 : i32, i32
  }
  func.func @transform_36(%arg0: i32) -> (i32, i32) {
    %c0_i32 = arith.constant 0 : i32
    %c0_i32_0 = arith.constant 0 : i32
    %c0_i32_1 = arith.constant 0 : i32
    return %c0_i32, %c0_i32_0 : i32, i32
  }
  func.func @transform_37(%arg0: i32) -> (i32, i32) {
    %c0_i32 = arith.constant 0 : i32
    %c0_i32_0 = arith.constant 0 : i32
    %c0_i32_1 = arith.constant 0 : i32
    return %c0_i32, %c0_i32_0 : i32, i32
  }
  func.func @transform_38(%arg0: i32) -> (i32, i32) {
    %c0_i32 = arith.constant 0 : i32
    %c0_i32_0 = arith.constant 0 : i32
    %c0_i32_1 = arith.constant 0 : i32
    return %c0_i32, %c0_i32_0 : i32, i32
  }
  func.func @transform_39(%arg0: i32) -> (i32, i32) {
    %c0_i32 = arith.constant 0 : i32
    %c0_i32_0 = arith.constant 0 : i32
    %c0_i32_1 = arith.constant 0 : i32
    return %c0_i32, %c0_i32_0 : i32, i32
  }
  func.func @transform_40(%arg0: i32) -> (i32, i32) {
    %c0_i32 = arith.constant 0 : i32
    %c0_i32_0 = arith.constant 0 : i32
    %c0_i32_1 = arith.constant 0 : i32
    return %c0_i32, %c0_i32_0 : i32, i32
  }
  func.func @transform_41(%arg0: i32) -> (i32, i32) {
    %c0_i32 = arith.constant 0 : i32
    %c0_i32_0 = arith.constant 0 : i32
    return %arg0, %c0_i32 : i32, i32
  }
}

</mosaic_0001>

<bundles_post_ra>
// kernel: relation_pred_head_v2_forward.3
= control target key start
LH: loop header
LB: loop body
LE: loop exit
PB: predicated region body
PF: predicated region fallthrough
CT: control target
= control target key end

     0   :  { %v272_v2 = vmov 0   ;;  %s422_s0 = inlined_call_operand.vmem [shape: f32[8,16,1], index: 0, kind: input, shape index: {}]   ;;  %s423_s1 = inlined_call_operand.vmem [shape: f32[8,1,16], index: 1, kind: input, shape index: {}]   ;;  %s424_s2 = inlined_call_operand.vmem [shape: f32[1,16,16], index: 2, kind: input, shape index: {}]   ;;  %s425_s3 = inlined_call_operand.hbm [shape: f32[8,16,16], index: 3, kind: output, shape index: {}]  }
   0x1   :  { %v17_v0 = vld [vmem:[%s422_s0 + $0x10] sm:$0xff]  ;;  %v15_v1 = vld [vmem:[%s422_s0] sm:$0xff]  ;;  %247 = vset.pattern.permute.xlu1 %v272_v2  ;;  %246 = vset.pattern.permute.xlu0 %v272_v2  ;;  %v18_v3 = vld [vmem:[%s422_s0 + $0x18] sm:$0xff] }
   0x2   :  { %51 = vperm.xlu1 %247, %v17_v0   ;;  %41 = vperm.xlu0 %246, %v15_v1   ;;  %v16_v4 = vld [vmem:[%s422_s0 + $0x8] sm:$0xff] }
   0x6   :  { %56 = vperm.xlu1 %247, %v18_v3   ;;  %46 = vperm.xlu0 %246, %v16_v4  }
   0x7   :  { %8 = vsyncpa [#allocation3], 0  ;;  %v20_v5 = vld [vmem:[%s422_s0 + $0x28] sm:$0xff]  ;;  %v19_v6 = vld [vmem:[%s422_s0 + $0x20] sm:$0xff]  ;;  %vm201_vm0 = vcmask 130048   ;;  %s273_s8 = smov [#allocation2]  }
   0x8   :  { %v22_v7 = vld [vmem:[%s422_s0 + $0x38] sm:$0xff]  ;;  %v21_v8 = vld [vmem:[%s422_s0 + $0x30] sm:$0xff]  ;;  %v24_v9 = vld [vmem:[%s422_s0 + $0x48] sm:$0xff]  ;;  %s223_s9 = sshll.u32 %s273_s8, 4  ;;  %s224_s9 = int_to_ptr.vmem [resolvable:$true] %s223_s9 }
   0x9   :  { %v23_v10 = vld [vmem:[%s422_s0 + $0x40] sm:$0xff]  ;;  %v26_v11 = vld [vmem:[%s422_s0 + $0x58] sm:$0xff]  ;;  %v25_v12 = vld [vmem:[%s422_s0 + $0x50] sm:$0xff]  ;;  %p253_p1 = scmp.lt.s32.totalorder %s224_s9, %s224_s9 }
   0xa   :  { %66 = vperm.xlu1 %247, %v20_v5   ;;  %61 = vperm.xlu0 %246, %v19_v6   ;;  %v28_v13 = vld [vmem:[%s422_s0 + $0x68] sm:$0xff]  ;;  %v27_v14 = vld [vmem:[%s422_s0 + $0x60] sm:$0xff]  ;;  %v30_v15 = vld [vmem:[%s422_s0 + $0x78] sm:$0xff] }
   0xb   :  { %v29_v16 = vld [vmem:[%s422_s0 + $0x70] sm:$0xff]  ;;  %v235_v17 = vld [vmem:[%s423_s1 + $0x1] ss:$0 sm:$0xff]  ;;  %v234_v18 = vld [vmem:[%s423_s1] ss:$0 sm:$0xff] }
   0xc   :  { %v353_v19 = vld [vmem:[%s424_s2] sm:$0xff]  ;;  %v360_v26 = vld [vmem:[%s424_s2 + $0x8] sm:$0xff] }
   0xd   :  { %v236_v31 = vld [vmem:[%s423_s1 + $0x2] ss:$0 sm:$0xff]  ;;  %v237_v38 = vld [vmem:[%s423_s1 + $0x3] ss:$0 sm:$0xff]  ;;  %v238_v45 = vld [vmem:[%s423_s1 + $0x4] ss:$0 sm:$0xff] }
   0xe   :  { %76 = vperm.xlu1 %247, %v22_v7   ;;  %71 = vperm.xlu0 %246, %v21_v8   ;;  %v239_v52 = vld [vmem:[%s423_s1 + $0x5] ss:$0 sm:$0xff]  ;;  %v240_v59 = vld [vmem:[%s423_s1 + $0x6] ss:$0 sm:$0xff]  ;;  %v241_v2 = vld [vmem:[%s423_s1 + $0x7] ss:$0 sm:$0xff] }
   0xf   :  { %s248_s1 = scalar_lea.vmem %s224_s9, 2048 }
  0x10   :  { %p249_p0 = scmp.ne.s32.totalorder %s224_s9, %s248_s1  ;;  %p254_p2 = scmp.lt.s32.totalorder %s248_s1, %s248_s1 }
  0x12   :  { %86 = vperm.xlu1 %247, %v24_v9   ;;  %81 = vperm.xlu0 %246, %v23_v10   ;;  %p255_p3 = por %p254_p2, %p253_p1 }
  0x14   :  { %p256_p4 = pnand %p255_p3, %p249_p0 }
  0x16   :  { %96 = vperm.xlu1 %247, %v26_v11   ;;  %91 = vperm.xlu0 %246, %v25_v12  }
  0x1a   :  { %106 = vperm.xlu1 %247, %v28_v13   ;;  %101 = vperm.xlu0 %246, %v27_v14  }
  0x1e   :  { %116 = vperm.xlu1 %247, %v30_v15   ;;  %111 = vperm.xlu0 %246, %v29_v16  }
  0x81   :  { %v52_v20 = vpop.permute.xlu1 %51  ;;  %v42_v21 = vpop.permute.xlu0 %41 }
  0x82   :  { %v169_v22 = vadd.f32 %v235_v17, %v52_v20  ;;  %v167_v23 = vadd.f32 %v234_v18, %v42_v21 }
  0x84   :  { %v187_v24 = vmul.f32 %v353_v19, %v169_v22  ;;  %v185_v25 = vmul.f32 %v353_v19, %v167_v23 }
  0x85   :  { %v57_v27 = vpop.permute.xlu1 %56  ;;  %v47_v28 = vpop.permute.xlu0 %46 }
  0x86   :  { %204 = vst.msk [vmem:[#allocation2 + $0x10] sm:$0xff] %vm201_vm0, %v187_v24  ;;  %202 = vst.msk [vmem:[#allocation2] sm:$0xff] %vm201_vm0, %v185_v25  ;;  %v170_v29 = vadd.f32 %v235_v17, %v57_v27  ;;  %v168_v30 = vadd.f32 %v234_v18, %v47_v28 }
  0x88   :  { %v188_v32 = vmul.f32 %v360_v26, %v170_v29  ;;  %v186_v33 = vmul.f32 %v360_v26, %v168_v30 }
  0x89   :  { %v67_v34 = vpop.permute.xlu1 %66  ;;  %v62_v35 = vpop.permute.xlu0 %61 }
  0x8a   :  { %205 = vst.msk [vmem:[#allocation2 + $0x18] sm:$0xff] %vm201_vm0, %v188_v32  ;;  %203 = vst.msk [vmem:[#allocation2 + $0x8] sm:$0xff] %vm201_vm0, %v186_v33  ;;  %v172_v36 = vadd.f32 %v236_v31, %v67_v34  ;;  %v171_v37 = vadd.f32 %v236_v31, %v62_v35 }
  0x8c   :  { %v190_v39 = vmul.f32 %v360_v26, %v172_v36  ;;  %v189_v40 = vmul.f32 %v353_v19, %v171_v37 }
  0x8d   :  { %v77_v41 = vpop.permute.xlu1 %76  ;;  %v72_v42 = vpop.permute.xlu0 %71 }
  0x8e   :  { %207 = vst.msk [vmem:[#allocation2 + $0x28] sm:$0xff] %vm201_vm0, %v190_v39  ;;  %206 = vst.msk [vmem:[#allocation2 + $0x20] sm:$0xff] %vm201_vm0, %v189_v40  ;;  %v174_v43 = vadd.f32 %v237_v38, %v77_v41  ;;  %v173_v44 = vadd.f32 %v237_v38, %v72_v42 }
  0x90   :  { %v192_v46 = vmul.f32 %v360_v26, %v174_v43  ;;  %v191_v47 = vmul.f32 %v353_v19, %v173_v44 }
  0x91   :  { %v87_v48 = vpop.permute.xlu1 %86  ;;  %v82_v49 = vpop.permute.xlu0 %81 }
  0x92   :  { %209 = vst.msk [vmem:[#allocation2 + $0x38] sm:$0xff] %vm201_vm0, %v192_v46  ;;  %208 = vst.msk [vmem:[#allocation2 + $0x30] sm:$0xff] %vm201_vm0, %v191_v47  ;;  %v176_v50 = vadd.f32 %v238_v45, %v87_v48  ;;  %v175_v51 = vadd.f32 %v238_v45, %v82_v49 }
  0x94   :  { %v194_v53 = vmul.f32 %v360_v26, %v176_v50  ;;  %v193_v54 = vmul.f32 %v353_v19, %v175_v51 }
  0x95   :  { %v97_v55 = vpop.permute.xlu1 %96  ;;  %v92_v56 = vpop.permute.xlu0 %91 }
  0x96   :  { %211 = vst.msk [vmem:[#allocation2 + $0x48] sm:$0xff] %vm201_vm0, %v194_v53  ;;  %210 = vst.msk [vmem:[#allocation2 + $0x40] sm:$0xff] %vm201_vm0, %v193_v54  ;;  %v178_v57 = vadd.f32 %v239_v52, %v97_v55  ;;  %v177_v58 = vadd.f32 %v239_v52, %v92_v56 }
  0x98   :  { %v196_v60 = vmul.f32 %v360_v26, %v178_v57  ;;  %v195_v61 = vmul.f32 %v353_v19, %v177_v58 }
  0x99   :  { %v107_v62 = vpop.permute.xlu1 %106  ;;  %v102_v63 = vpop.permute.xlu0 %101 }
  0x9a   :  { %213 = vst.msk [vmem:[#allocation2 + $0x58] sm:$0xff] %vm201_vm0, %v196_v60  ;;  %212 = vst.msk [vmem:[#allocation2 + $0x50] sm:$0xff] %vm201_vm0, %v195_v61  ;;  %v180_v0 = vadd.f32 %v240_v59, %v107_v62  ;;  %v179_v1 = vadd.f32 %v240_v59, %v102_v63 }
  0x9c   :  { %v198_v3 = vmul.f32 %v360_v26, %v180_v0  ;;  %v197_v4 = vmul.f32 %v353_v19, %v179_v1 }
  0x9d   :  { %v117_v5 = vpop.permute.xlu1 %116  ;;  %v112_v6 = vpop.permute.xlu0 %111 }
  0x9e   :  { %215 = vst.msk [vmem:[#allocation2 + $0x68] sm:$0xff] %vm201_vm0, %v198_v3  ;;  %214 = vst.msk [vmem:[#allocation2 + $0x60] sm:$0xff] %vm201_vm0, %v197_v4  ;;  %v182_v7 = vadd.f32 %v241_v2, %v117_v5  ;;  %v181_v8 = vadd.f32 %v241_v2, %v112_v6 }
  0xa0   :  { %v200_v9 = vmul.f32 %v360_v26, %v182_v7  ;;  %v199_v10 = vmul.f32 %v353_v19, %v181_v8 }
  0xa2   :  { %217 = vst.msk [vmem:[#allocation2 + $0x78] sm:$0xff] %vm201_vm0, %v200_v9  ;;  %216 = vst.msk [vmem:[#allocation2 + $0x70] sm:$0xff] %vm201_vm0, %v199_v10 }
  0xa3   :  { %259 = shalt.err (!%p256_p4)
}
  0xa4   :  { %s260_s12 = scalar_lea.hbm %s425_s3, 2048 }
  0xa5   :  { %p261_p5 = scmp.ne.s32.totalorder %s425_s3, %s260_s12  ;;  %p264_p6 = scmp.lt.u32.totalorder %s260_s12, %s425_s3 }
  0xa7   :  { %p266_p7 = pnand %p264_p6, %p261_p5 }
  0xa9   :  { %269 = shalt.err (!%p266_p7)
}
  0xaa   :  { %s274_s17 = smov 128   ;;  %s275_s18 = smov 8  }
  0xab   :  { %229 = dma.vmem_to_hbm [thread:$0]  %s224_s9, 2048, %s425_s3, [#allocation3], %s274_s17, %s274_s17, %s275_s18  }
  0xac   :  { %270 = dma.done.wait [#allocation3], 2048  }
  0xad   :  { %271 = vsyncadd [#allocation3], 4294965248 }
  0xae   :  { %233 = vsyncpa [#allocation3], 1 }

// kernel: relation_pred_head_v2_forward.2
= control target key start
LH: loop header
LB: loop body
LE: loop exit
PB: predicated region body
PF: predicated region fallthrough
CT: control target
= control target key end

     0   :  { %v2177_v0 = vmov 0.0   ;;  %s2178_s3 = smov 3   ;;  %vm2179_vm0 = vmmov 0   ;;  %vm309_vm1 = vcmask 261120   ;;  %s2180_s10 = smov 4   ;;  %vm354_vm2 = vcmask 523264   ;;  %s2542_s0 = inlined_call_operand.smem [shape: u32[42], index: -1, kind: input, shape index: {}] }
   0x1   :  { %1866 = vmatprep.subr.bf16.mxu0 %v2177_v0  ;;  %s1689_s6 = sld [smem:[%s2542_s0 + %s2178_s3]]   ;;  %1870 = vmatprep.mubr.msk.bf16.mxu0 %vm2179_vm0, %v2177_v0  ;;  %s2181_s14 = smov 7  }
   0x2   :  { %s1_s9 = sld [smem:[%s2542_s0]]   ;;  %1874 = vmatprep.subr.bf16.mxu1 %v2177_v0  ;;  %1882 = vmatprep.mubr.msk.bf16.mxu1 %vm2179_vm0, %v2177_v0  ;;  %s2182_s18 = smov 5  }
   0x3   :  { %s1690_s13 = sld [smem:[%s2542_s0 + %s2180_s10]]   ;;  %s2183_s22 = smov 6  }
   0x4   :  { %s1693_s17 = sld [smem:[%s2542_s0 + %s2181_s14]]   ;;  %s2184_s26 = smov 8  }
   0x5   :  { %s1691_s21 = sld [smem:[%s2542_s0 + %s2182_s18]]   ;;  %s2185_s30 = smov 11  }
   0x6   :  { %s1692_s25 = sld [smem:[%s2542_s0 + %s2183_s22]]   ;;  %s2186_s4 = smov 13  }
   0x7   :  { %v2049_v1 = vld [vmem:[%s1689_s6] sm:$0xff]   ;;  %v2050_v2 = vld [vmem:[%s1689_s6 + $0x8] sm:$0xff]   ;;  %s1694_s29 = sld [smem:[%s2542_s0 + %s2184_s26]]   ;;  %s2187_s8 = smov 9  }
   0x8   :  { %1867 = vmatpush3.bf16.msra.mxu0 %v2049_v1  ;;  %v171_v3 = vld [vmem:[%s1_s9] sm:$0xff]  ;;  %v172_v4 = vld [vmem:[%s1_s9 + $0x8] sm:$0xff]  ;;  %s1697_s3 = sld [smem:[%s2542_s0 + %s2185_s30]]   ;;  %s2188_s12 = smov 10  }
   0x9   :  { %1868 = vmatprep.subr.bf16.mxu0 %v2177_v0  ;;  %v290_v5 = vpack.c.bf16 %v172_v4, %v171_v3  ;;  %v1728_v6 = vld [vmem:[%s1690_s13] ss:$0 sm:$0xff]  ;;  %s2282_s7 = sld [smem:[%s2542_s0 + %s2186_s4]]   ;;  %s2189_s16 = smov 1  }
   0xa   :  { %v2051_v25 = vld [vmem:[%s1693_s17] sm:$0xff]   ;;  %v2052_v26 = vld [vmem:[%s1693_s17 + $0x8] sm:$0xff]   ;;  %v2053_v27 = vld [vmem:[%s1693_s17 + $0x10] sm:$0xff]   ;;  %s1695_s11 = sld [smem:[%s2542_s0 + %s2187_s8]]   ;;  %s2190_s20 = smov 12  }
   0xb   :  { %1875 = vmatpush3.bf16.msra.mxu1 %v2051_v25  ;;  %v2054_v28 = vld [vmem:[%s1693_s17 + $0x18] sm:$0xff]   ;;  %v1732_v36 = vld [vmem:[%s1691_s21] ss:$0 sm:$0xff]  ;;  %s1696_s15 = sld [smem:[%s2542_s0 + %s2188_s12]]   ;;  %s2191_s24 = smov 14  }
   0xc   :  { %1869 = vmatpush3.bf16.msra.mxu0 %v2050_v2  ;;  %1876 = vmatprep.subr.bf16.mxu1 %v2177_v0  ;;  %v1733_v38 = vld [vmem:[%s1692_s25] ss:$0 sm:$0xff]  ;;  %s1687_s19 = sld [smem:[%s2542_s0 + %s2189_s16]]   ;;  %s2192_s28 = smov 17  }
   0xd   :  { %1906 = vmatprep.subr.bf16.mxu0 %v2177_v0  ;;  %v1734_v3 = vld [vmem:[%s1694_s29] ss:$0 sm:$0xff]  ;;  %s1698_s23 = sld [smem:[%s2542_s0 + %s2190_s20]]   ;;  %s2193_s2 = smov 23  }
   0xe   :  { %v2058_v25 = vld [vmem:[%s1697_s3 + $0x18] sm:$0xff]   ;;  %s1700_s27 = sld [smem:[%s2542_s0 + %s2191_s24]]   ;;  %s2194_s6 = smov 15  }
   0xf   :  { %1871 = vmatmul.mubr.msk.bf16.vlgmr.msra.gmra.mrb[0].mxu0 %vm309_vm1, %v290_v5  ;;  %1877 = vmatpush3.bf16.msra.mxu1 %v2052_v26  ;;  %s1703_s1 = sld [smem:[%s2542_s0 + %s2192_s28]]   ;;  %s2195_s10 = smov 16  }
  0x10   :  { %1914 = vmatprep.mubr.msk.bf16.mxu0 %vm2179_vm0, %v2177_v0  ;;  %1878 = vmatprep.subr.bf16.mxu1 %v2177_v0  ;;  %s2329_s5 = sld [smem:[%s2542_s0 + %s2193_s2]]   ;;  %s2196_s14 = smov 2  }
  0x11   :  { %s1701_s9 = sld [smem:[%s2542_s0 + %s2194_s6]]   ;;  %s2197_s18 = smov 18  }
  0x12   :  { %s1702_s13 = sld [smem:[%s2542_s0 + %s2195_s10]]   ;;  %s2198_s22 = smov 24  }
  0x13   :  { %1879 = vmatpush3.bf16.msra.mxu1 %v2053_v27  ;;  %s1688_s17 = sld [smem:[%s2542_s0 + %s2196_s14]]   ;;  %s2199_s26 = smov 21  }
  0x14   :  { %1880 = vmatprep.subr.bf16.mxu1 %v2177_v0  ;;  %s1704_s21 = sld [smem:[%s2542_s0 + %s2197_s18]]   ;;  %s2200_s30 = smov 27  }
  0x15   :  { %s1710_s25 = sld [smem:[%s2542_s0 + %s2198_s22]]   ;;  %s2201_s4 = smov 19  }
  0x16   :  { %s1707_s29 = sld [smem:[%s2542_s0 + %s2199_s26]]   ;;  %s2202_s8 = smov 20  }
  0x17   :  { %1881 = vmatpush3.bf16.msra.mxu1 %v2054_v28  ;;  %s2203_s12 = smov 25   ;;  %s2204_s16 = smov 26  }
  0x18   :  { %1886 = vmatprep.subr.bf16.mxu1 %v2177_v0  ;;  %s2205_s20 = smov 34   ;;  %s2206_s24 = smov 22  }
  0x19   :  { %s2207_s28 = smov 28   ;;  %s2208_s2 = smov 31  }
  0x1a   :  { %s2209_s6 = smov 33   ;;  %s2210_s10 = smov 35  }
  0x1b   :  { %s2211_s14 = smov 29   ;;  %s2212_s18 = smov 30  }
  0x1c   :  { %s2213_s22 = smov 32   ;;  %s2214_s26 = smov 36  }
  0xe2   :  { %v347_v7 = vpop.f32.mrb[0].mxu0 }
  0xe3   :  { %v348_v8 = vadd.f32 %v1728_v6, %v347_v7  ;;  %v1872_v9 = vpop.f32.mrb[1].mxu0 }
  0xe4   :  { %v350_v10 = vpop.f32.mrb[2].mxu0 }
  0xe5   :  { %v351_v11 = vadd.f32 %v1728_v6, %v350_v10  ;;  %v1873_v12 = vpop.f32.mrb[3].mxu0  ;;  %v355_v13 = vsel %vm354_vm2, %v348_v8, 0.0 }
  0xe6   :  { %356 = vadd.xlane.f32.xlu0 %v355_v13 }
  0xe7   :  { %v358_v14 = vsel %vm354_vm2, %v351_v11, 0.0 }
  0xea   :  { %359 = vadd.xlane.f32.xlu0 %v358_v14 }
 0x173   :  { %v357_v15 = vpop.xlane.xlu0 %356 }
 0x174   :  { %v362_v16 = vmul.f32 0.015625, %v357_v15 }
 0x176   :  { %v364_v17 = vsub.f32 %v348_v8, %v362_v16 }
 0x177   :  { %v360_v18 = vpop.xlane.xlu0 %359 }
 0x178   :  { %v363_v19 = vmul.f32 0.015625, %v360_v18  ;;  %v366_v20 = vmul.f32 %v364_v17, %v364_v17 }
 0x17a   :  { %v365_v21 = vsub.f32 %v351_v11, %v363_v19  ;;  %v368_v22 = vsel %vm354_vm2, %v366_v20, 0.0 }
 0x17b   :  { %369 = vadd.xlane.f32.xlu1 %v368_v22  ;;  %v2055_v22 = vld [vmem:[%s1697_s3] sm:$0xff]  }
 0x17c   :  { %v367_v23 = vmul.f32 %v365_v21, %v365_v21 }
 0x17e   :  { %v371_v24 = vsel %vm354_vm2, %v367_v23, 0.0  ;;  %v2056_v23 = vld [vmem:[%s1697_s3 + $0x8] sm:$0xff]  }
 0x17f   :  { %372 = vadd.xlane.f32.xlu1 %v371_v24  ;;  %v2057_v24 = vld [vmem:[%s1697_s3 + $0x10] sm:$0xff]   ;;  %s2384_s3 = sld [smem:[%s2542_s0 + %s2200_s30]]   ;;  %s2215_s30 = smov 39  }
 0x208   :  { %v370_v29 = vpop.xlane.xlu1 %369 }
 0x209   :  { %v374_v30 = vmul.f32 0.015625, %v370_v29 }
 0x20b   :  { %v376_v31 = vadd.f32 1e-05, %v374_v30 }
 0x20c   :  { %v373_v32 = vpop.xlane.xlu1 %372 }
 0x20d   :  { %2093 = vrsqrt.f32 %v376_v31  ;;  %v375_v33 = vmul.f32 0.015625, %v373_v32 }
 0x20f   :  { %v377_v34 = vadd.f32 1e-05, %v375_v33  ;;  %v1740_v33 = vld [vmem:[%s1695_s11] ss:$0 sm:$0xff]  ;;  %s1706_s11 = sld [smem:[%s2542_s0 + %s2202_s8]]   ;;  %s2217_s8 = smov 38  }
 0x211   :  { %2095 = vrsqrt.f32 %v377_v34 }
 0x217   :  { %v2094_v35 = vpop.eup %2093 }
 0x218   :  { %v380_v37 = vmul.f32 %v2094_v35, %v364_v17 }
 0x21a   :  { %v388_v39 = vmul.f32 %v1732_v36, %v380_v37 }
 0x21b   :  { %v2096_v40 = vpop.eup %2095 }
 0x21c   :  { %v381_v41 = vmul.f32 %v2096_v40, %v365_v21  ;;  %v396_v42 = vadd.f32 %v1733_v38, %v388_v39 }
 0x21e   :  { %v389_v43 = vmul.f32 %v1732_v36, %v381_v41  ;;  %v398_v44 = vmin.f32 %v396_v42, 20.0  ;;  %vm408_vm3 = vcmp.gt.f32.partialorder %v396_v42, 20.0  ;;  %v1741_v36 = vld [vmem:[%s1696_s15] ss:$0 sm:$0xff]  ;;  %s1711_s15 = sld [smem:[%s2542_s0 + %s2203_s12]]   ;;  %s2218_s12 = smov 40  }
 0x220   :  { %v397_v45 = vadd.f32 %v1733_v38, %v389_v43  ;;  %v400_v46 = vmul.f32 1.442695, %v398_v44 }
 0x222   :  { %v399_v47 = vmin.f32 %v397_v45, 20.0  ;;  %2097 = vpow2.f32 %v400_v46  ;;  %vm409_vm4 = vcmp.gt.f32.partialorder %v397_v45, 20.0 }
 0x224   :  { %v402_v48 = vmul.f32 1.442695, %v399_v47 }
 0x226   :  { %2099 = vpow2.f32 %v402_v48 }
 0x22c   :  { %v2098_v49 = vpop.eup %2097 }
 0x22d   :  { %v404_v50 = vadd.f32 2.0, %v2098_v49 }
 0x22f   :  { %v406_v51 = vmul.f32 %v2098_v49, %v404_v50 }
 0x230   :  { %v2100_v52 = vpop.eup %2099 }
 0x231   :  { %v405_v53 = vadd.f32 2.0, %v2100_v52  ;;  %v412_v54 = vadd.f32 2.0, %v406_v51  ;;  %v410_v58 = vmul.f32 %v406_v51, %v396_v42 }
 0x233   :  { %v407_v55 = vmul.f32 %v2100_v52, %v405_v53  ;;  %2101 = vrcp.f32 %v412_v54 }
 0x235   :  { %v413_v56 = vadd.f32 2.0, %v407_v55  ;;  %v411_v59 = vmul.f32 %v407_v55, %v397_v45 }
 0x237   :  { %2103 = vrcp.f32 %v413_v56 }
 0x23d   :  { %v2102_v57 = vpop.eup %2101 }
 0x23e   :  { %v415_v60 = vmul.f32 %v2102_v57, %v410_v58 }
 0x240   :  { %v418_v63 = vsel %vm408_vm3, %v396_v42, %v415_v60 }
 0x241   :  { %v2104_v61 = vpop.eup %2103 }
 0x242   :  { %v417_v62 = vmul.f32 %v2104_v61, %v411_v59 }
 0x244   :  { %v419_v1 = vsel %vm409_vm4, %v397_v45, %v417_v62  ;;  %v2059_v62 = vld [vmem:[%s2282_s7] sm:$0xff]  }
 0x245   :  { %v420_v2 = vpack.c.bf16 %v419_v1, %v418_v63  ;;  %v2060_v1 = vld [vmem:[%s2282_s7 + $0x8] sm:$0xff]   ;;  %s1705_s7 = sld [smem:[%s2542_s0 + %s2201_s4]]   ;;  %s2216_s4 = smov 37  }
 0x247   :  { %1883 = vmatmul.mubr.msk.bf16.vlgmr.msra.gmra.mrb[0].mxu1 %vm354_vm2, %v420_v2  ;;  %v173_v2 = vld [vmem:[%s1687_s19] sm:$0xff] }
 0x248   :  { %1894 = vmatprep.mubr.msk.bf16.mxu1 %vm2179_vm0, %v2177_v0  ;;  %1887 = vmatpush3.bf16.msra.mxu1 %v2055_v22 }
 0x249   :  { %1888 = vmatprep.subr.bf16.mxu1 %v2177_v0 }
 0x24c   :  { %1889 = vmatpush3.bf16.msra.mxu1 %v2056_v23 }
 0x24d   :  { %1890 = vmatprep.subr.bf16.mxu1 %v2177_v0 }
 0x250   :  { %1891 = vmatpush3.bf16.msra.mxu1 %v2057_v24 }
 0x251   :  { %1892 = vmatprep.subr.bf16.mxu1 %v2177_v0 }
 0x254   :  { %1893 = vmatpush3.bf16.msra.mxu1 %v2058_v25 }
 0x255   :  { %1898 = vmatprep.subr.bf16.mxu1 %v2177_v0 }
 0x31a   :  { %v488_v4 = vpop.f32.mrb[0].mxu1 }
 0x31b   :  { %v489_v5 = vadd.f32 %v1734_v3, %v488_v4  ;;  %v1884_v6 = vpop.f32.mrb[1].mxu1 }
 0x31c   :  { %v491_v7 = vpop.f32.mrb[2].mxu1 }
 0x31d   :  { %v492_v8 = vadd.f32 %v1734_v3, %v491_v7  ;;  %v1885_v9 = vpop.f32.mrb[3].mxu1  ;;  %v495_v10 = vsel %vm354_vm2, %v489_v5, 0.0  ;;  %v174_v3 = vld [vmem:[%s1687_s19 + $0x8] sm:$0xff]  ;;  %s1712_s19 = sld [smem:[%s2542_s0 + %s2204_s16]]   ;;  %s2219_s16 = smov 41  }
 0x31e   :  { %496 = vadd.xlane.f32.xlu0 %v495_v10  ;;  %v634_v4 = vpack.c.bf16 %v174_v3, %v173_v2 }
 0x31f   :  { %v498_v11 = vsel %vm354_vm2, %v492_v8, 0.0 }
 0x320   :  { %499 = vadd.xlane.f32.xlu1 %v498_v11 }
 0x3ab   :  { %v497_v12 = vpop.xlane.xlu0 %496 }
 0x3ac   :  { %v501_v13 = vmul.f32 0.015625, %v497_v12 }
 0x3ad   :  { %v500_v14 = vpop.xlane.xlu1 %499 }
 0x3ae   :  { %v503_v15 = vsub.f32 %v489_v5, %v501_v13  ;;  %v502_v16 = vmul.f32 0.015625, %v500_v14  ;;  %v1742_v5 = vld [vmem:[%s1698_s23] ss:$0 sm:$0xff]  ;;  %s1720_s23 = sld [smem:[%s2542_s0 + %s2205_s20]]  }
 0x3af   :  { %v1748_v13 = vld [vmem:[%s1700_s27] ss:$0 sm:$0xff]  ;;  %s1708_s27 = sld [smem:[%s2542_s0 + %s2206_s24]]  }
 0x3b0   :  { %v504_v17 = vsub.f32 %v492_v8, %v502_v16  ;;  %v505_v18 = vmul.f32 %v503_v15, %v503_v15 }
 0x3b2   :  { %v507_v19 = vsel %vm354_vm2, %v505_v18, 0.0  ;;  %v506_v20 = vmul.f32 %v504_v17, %v504_v17 }
 0x3b3   :  { %508 = vadd.xlane.f32.xlu0 %v507_v19 }
 0x3b4   :  { %v510_v21 = vsel %vm354_vm2, %v506_v20, 0.0 }
 0x3b5   :  { %511 = vadd.xlane.f32.xlu1 %v510_v21 }
 0x440   :  { %v509_v26 = vpop.xlane.xlu0 %508 }
 0x441   :  { %v513_v27 = vmul.f32 0.015625, %v509_v26 }
 0x442   :  { %v512_v28 = vpop.xlane.xlu1 %511 }
 0x443   :  { %v515_v29 = vadd.f32 1e-05, %v513_v27  ;;  %v514_v30 = vmul.f32 0.015625, %v512_v28 }
 0x445   :  { %2105 = vrsqrt.f32 %v515_v29  ;;  %v516_v31 = vadd.f32 1e-05, %v514_v30 }
 0x447   :  { %2107 = vrsqrt.f32 %v516_v31 }
 0x44f   :  { %v2106_v32 = vpop.eup %2105 }
 0x450   :  { %v519_v34 = vmul.f32 %v2106_v32, %v503_v15  ;;  %v2061_v32 = vld [vmem:[%s1703_s1] sm:$0xff]  }
 0x451   :  { %v2108_v35 = vpop.eup %2107  ;;  %1907 = vmatpush3.bf16.msra.mxu0 %v2061_v32 }
 0x452   :  { %v527_v37 = vmul.f32 %v1740_v33, %v519_v34  ;;  %v520_v38 = vmul.f32 %v2108_v35, %v504_v17  ;;  %1908 = vmatprep.subr.bf16.mxu0 %v2177_v0  ;;  %v2063_v34 = vld [vmem:[%s1703_s1 + $0x10] sm:$0xff]   ;;  %v2064_v35 = vld [vmem:[%s1703_s1 + $0x18] sm:$0xff]  }
 0x454   :  { %v535_v39 = vadd.f32 %v1741_v36, %v527_v37  ;;  %v528_v40 = vmul.f32 %v1740_v33, %v520_v38  ;;  %v2062_v33 = vld [vmem:[%s1703_s1 + $0x8] sm:$0xff]   ;;  %s1714_s1 = sld [smem:[%s2542_s0 + %s2207_s28]]  }
 0x455   :  { %1909 = vmatpush3.bf16.msra.mxu0 %v2062_v33 }
 0x456   :  { %v537_v41 = vmin.f32 %v535_v39, 20.0  ;;  %v536_v42 = vadd.f32 %v1741_v36, %v528_v40  ;;  %vm547_vm5 = vcmp.gt.f32.partialorder %v535_v39, 20.0  ;;  %1910 = vmatprep.subr.bf16.mxu0 %v2177_v0 }
 0x458   :  { %v539_v43 = vmul.f32 1.442695, %v537_v41  ;;  %v538_v44 = vmin.f32 %v536_v42, 20.0  ;;  %vm548_vm6 = vcmp.gt.f32.partialorder %v536_v42, 20.0 }
 0x459   :  { %1911 = vmatpush3.bf16.msra.mxu0 %v2063_v34 }
 0x45a   :  { %2109 = vpow2.f32 %v539_v43  ;;  %v541_v45 = vmul.f32 1.442695, %v538_v44  ;;  %1912 = vmatprep.subr.bf16.mxu0 %v2177_v0  ;;  %v1752_v43 = vld [vmem:[%s1701_s9] ss:$0 sm:$0xff]  ;;  %s2455_s9 = sld [smem:[%s2542_s0 + %s2209_s6]]  }
 0x45c   :  { %2111 = vpow2.f32 %v541_v45 }
 0x45d   :  { %1913 = vmatpush3.bf16.msra.mxu0 %v2064_v35 }
 0x45e   :  { %1930 = vmatprep.subr.bf16.mxu0 %v2177_v0 }
 0x464   :  { %v2110_v46 = vpop.eup %2109 }
 0x465   :  { %v543_v47 = vadd.f32 2.0, %v2110_v46 }
 0x466   :  { %v2112_v48 = vpop.eup %2111 }
 0x467   :  { %v544_v49 = vadd.f32 2.0, %v2112_v48  ;;  %v545_v50 = vmul.f32 %v2110_v46, %v543_v47  ;;  %v1753_v46 = vld [vmem:[%s1702_s13] ss:$0 sm:$0xff]  ;;  %s2460_s13 = sld [smem:[%s2542_s0 + %s2210_s10]]  }
 0x469   :  { %v546_v51 = vmul.f32 %v2112_v48, %v544_v49  ;;  %v551_v52 = vadd.f32 2.0, %v545_v50  ;;  %v549_v54 = vmul.f32 %v545_v50, %v535_v39 }
 0x46b   :  { %v552_v53 = vadd.f32 2.0, %v546_v51  ;;  %2113 = vrcp.f32 %v551_v52  ;;  %v550_v56 = vmul.f32 %v546_v51, %v536_v42 }
 0x46d   :  { %2115 = vrcp.f32 %v552_v53 }
 0x475   :  { %v2114_v55 = vpop.eup %2113 }
 0x476   :  { %v554_v57 = vmul.f32 %v2114_v55, %v549_v54 }
 0x477   :  { %v2116_v58 = vpop.eup %2115 }
 0x478   :  { %v556_v59 = vmul.f32 %v2116_v58, %v550_v56  ;;  %v557_v60 = vsel %vm547_vm5, %v535_v39, %v554_v57 }
 0x47a   :  { %v558_v61 = vsel %vm548_vm6, %v536_v42, %v556_v59 }
 0x47b   :  { %v559_v63 = vpack.c.bf16 %v558_v61, %v557_v60 }
 0x47d   :  { %1895 = vmatmul.mubr.msk.bf16.vlgmr.msra.gmra.mrb[4].mxu1 %vm354_vm2, %v559_v63 }
 0x47e   :  { %1899 = vmatpush3.bf16.msra.mxu1 %v2059_v62  ;;  %1902 = vmatprep.mubr.msk.bf16.mxu1 %vm2179_vm0, %v2177_v0 }
 0x47f   :  { %1900 = vmatprep.subr.bf16.mxu1 %v2177_v0 }
 0x482   :  { %1901 = vmatpush3.bf16.msra.mxu1 %v2060_v1 }
 0x483   :  { %1918 = vmatprep.subr.bf16.mxu1 %v2177_v0 }
 0x485   :  { %1903 = vmatmul.mubr.msk.bf16.vlgmr.msra.gmra.mrb[8].mxu1 %vm309_vm1, %v634_v4 }
 0x486   :  { %1926 = vmatprep.mubr.msk.bf16.mxu1 %vm2179_vm0, %v2177_v0 }
 0x550   :  { %v627_v6 = vpop.f32.mrb[4].mxu1 }
 0x551   :  { %v1896_v7 = vpop.f32.mrb[5].mxu1  ;;  %v2309_v9 = vadd.f32 %v1742_v5, %v627_v6 }
 0x552   :  { %v630_v8 = vpop.f32.mrb[6].mxu1 }
 0x553   :  { %v2311_v10 = vadd.f32 %v1742_v5, %v630_v8  ;;  %v1897_v11 = vpop.f32.mrb[7].mxu1 }
 0x554   :  { %v2065_v11 = vld [vmem:[%s2329_s5] sm:$0xff]  }
 0x555   :  { %v1316_v12 = vpack.c.bf16 %v2311_v10, %v2309_v9 }
 0x558   :  { %v690_v14 = vpop.f32.mrb[8].mxu1 }
 0x559   :  { %v691_v15 = vadd.f32 %v1748_v13, %v690_v14  ;;  %v1904_v16 = vpop.f32.mrb[9].mxu1  ;;  %v2066_v14 = vld [vmem:[%s2329_s5 + $0x8] sm:$0xff]   ;;  %s1717_s5 = sld [smem:[%s2542_s0 + %s2208_s2]]  }
 0x55a   :  { %v693_v17 = vpop.f32.mrb[10].mxu1  ;;  %v176_v16 = vld [vmem:[%s1688_s17 + $0x8] sm:$0xff] }
 0x55b   :  { %v694_v18 = vadd.f32 %v1748_v13, %v693_v17  ;;  %v1905_v19 = vpop.f32.mrb[11].mxu1  ;;  %v697_v20 = vsel %vm354_vm2, %v691_v15, 0.0 }
 0x55c   :  { %698 = vadd.xlane.f32.xlu0 %v697_v20 }
 0x55d   :  { %v700_v21 = vsel %vm354_vm2, %v694_v18, 0.0 }
 0x55e   :  { %701 = vadd.xlane.f32.xlu1 %v700_v21 }
 0x5e9   :  { %v699_v22 = vpop.xlane.xlu0 %698 }
 0x5ea   :  { %v703_v23 = vmul.f32 0.015625, %v699_v22 }
 0x5eb   :  { %v702_v24 = vpop.xlane.xlu1 %701 }
 0x5ec   :  { %v705_v25 = vsub.f32 %v691_v15, %v703_v23  ;;  %v704_v26 = vmul.f32 0.015625, %v702_v24  ;;  %v175_v15 = vld [vmem:[%s1688_s17] sm:$0xff]  ;;  %s1715_s17 = sld [smem:[%s2542_s0 + %s2211_s14]]  }
 0x5ed   :  { %v975_v17 = vpack.c.bf16 %v176_v16, %v175_v15  ;;  %v1761_v16 = vld [vmem:[%s1706_s11] ss:$0 sm:$0xff]  ;;  %s1724_s11 = sld [smem:[%s2542_s0 + %s2217_s8]]  }
 0x5ee   :  { %v706_v27 = vsub.f32 %v694_v18, %v704_v26  ;;  %v707_v28 = vmul.f32 %v705_v25, %v705_v25  ;;  %v1754_v18 = vld [vmem:[%s1704_s21] ss:$0 sm:$0xff]  ;;  %s1716_s21 = sld [smem:[%s2542_s0 + %s2212_s18]]  }
 0x5f0   :  { %v709_v29 = vsel %vm354_vm2, %v707_v28, 0.0  ;;  %v708_v30 = vmul.f32 %v706_v27, %v706_v27 }
 0x5f1   :  { %710 = vadd.xlane.f32.xlu0 %v709_v29 }
 0x5f2   :  { %v712_v31 = vsel %vm354_vm2, %v708_v30, 0.0 }
 0x5f3   :  { %713 = vadd.xlane.f32.xlu1 %v712_v31 }
 0x67e   :  { %v711_v36 = vpop.xlane.xlu0 %710 }
 0x67f   :  { %v715_v37 = vmul.f32 0.015625, %v711_v36 }
 0x680   :  { %v714_v38 = vpop.xlane.xlu1 %713 }
 0x681   :  { %v717_v39 = vadd.f32 1e-05, %v715_v37  ;;  %v716_v40 = vmul.f32 0.015625, %v714_v38 }
 0x683   :  { %2117 = vrsqrt.f32 %v717_v39  ;;  %v718_v41 = vadd.f32 1e-05, %v716_v40 }
 0x685   :  { %2119 = vrsqrt.f32 %v718_v41 }
 0x68d   :  { %v2118_v42 = vpop.eup %2117 }
 0x68e   :  { %v721_v44 = vmul.f32 %v2118_v42, %v705_v25 }
 0x68f   :  { %v2120_v45 = vpop.eup %2119 }
 0x690   :  { %v729_v47 = vmul.f32 %v1752_v43, %v721_v44  ;;  %v722_v48 = vmul.f32 %v2120_v45, %v706_v27  ;;  %v1768_v27 = vld [vmem:[%s1710_s25] ss:$0 sm:$0xff]  ;;  %s1718_s25 = sld [smem:[%s2542_s0 + %s2213_s22]]  }
 0x692   :  { %v737_v49 = vadd.f32 %v1753_v46, %v729_v47  ;;  %v730_v50 = vmul.f32 %v1752_v43, %v722_v48 }
 0x694   :  { %v739_v51 = vmin.f32 %v737_v49, 20.0  ;;  %v738_v52 = vadd.f32 %v1753_v46, %v730_v50  ;;  %vm749_vm7 = vcmp.gt.f32.partialorder %v737_v49, 20.0 }
 0x696   :  { %v741_v53 = vmul.f32 1.442695, %v739_v51  ;;  %v740_v54 = vmin.f32 %v738_v52, 20.0  ;;  %vm750_vm8 = vcmp.gt.f32.partialorder %v738_v52, 20.0 }
 0x698   :  { %2121 = vpow2.f32 %v741_v53  ;;  %v743_v55 = vmul.f32 1.442695, %v740_v54 }
 0x69a   :  { %2123 = vpow2.f32 %v743_v55 }
 0x6a2   :  { %v2122_v56 = vpop.eup %2121 }
 0x6a3   :  { %v745_v57 = vadd.f32 2.0, %v2122_v56 }
 0x6a4   :  { %v2124_v58 = vpop.eup %2123 }
 0x6a5   :  { %v746_v59 = vadd.f32 2.0, %v2124_v58  ;;  %v747_v60 = vmul.f32 %v2122_v56, %v745_v57  ;;  %v2067_v56 = vld [vmem:[%s1707_s29] sm:$0xff]   ;;  %v2068_v57 = vld [vmem:[%s1707_s29 + $0x8] sm:$0xff]  }
 0x6a6   :  { %1919 = vmatpush3.bf16.msra.mxu1 %v2067_v56 }
 0x6a7   :  { %v748_v61 = vmul.f32 %v2124_v58, %v746_v59  ;;  %v753_v62 = vadd.f32 2.0, %v747_v60  ;;  %v751_v1 = vmul.f32 %v747_v60, %v737_v49  ;;  %1920 = vmatprep.subr.bf16.mxu1 %v2177_v0  ;;  %v2069_v58 = vld [vmem:[%s1707_s29 + $0x10] sm:$0xff]   ;;  %v2070_v59 = vld [vmem:[%s1707_s29 + $0x18] sm:$0xff]   ;;  %s1722_s29 = sld [smem:[%s2542_s0 + %s2214_s26]]  }
 0x6a9   :  { %v754_v63 = vadd.f32 2.0, %v748_v61  ;;  %2125 = vrcp.f32 %v753_v62  ;;  %v752_v3 = vmul.f32 %v748_v61, %v738_v52 }
 0x6aa   :  { %1921 = vmatpush3.bf16.msra.mxu1 %v2068_v57 }
 0x6ab   :  { %2127 = vrcp.f32 %v754_v63  ;;  %1922 = vmatprep.subr.bf16.mxu1 %v2177_v0 }
 0x6ae   :  { %1923 = vmatpush3.bf16.msra.mxu1 %v2069_v58 }
 0x6af   :  { %1924 = vmatprep.subr.bf16.mxu1 %v2177_v0 }
 0x6b2   :  { %1925 = vmatpush3.bf16.msra.mxu1 %v2070_v59 }
 0x6b3   :  { %v2126_v2 = vpop.eup %2125  ;;  %1938 = vmatprep.subr.bf16.mxu1 %v2177_v0 }
 0x6b4   :  { %v756_v4 = vmul.f32 %v2126_v2, %v751_v1 }
 0x6b5   :  { %v2128_v5 = vpop.eup %2127 }
 0x6b6   :  { %v758_v6 = vmul.f32 %v2128_v5, %v752_v3  ;;  %v759_v7 = vsel %vm749_vm7, %v737_v49, %v756_v4 }
 0x6b8   :  { %v760_v8 = vsel %vm750_vm8, %v738_v52, %v758_v6 }
 0x6b9   :  { %v761_v13 = vpack.c.bf16 %v760_v8, %v759_v7 }
 0x6bb   :  { %1915 = vmatmul.mubr.msk.bf16.vlgmr.msra.gmra.mrb[4].mxu0 %vm354_vm2, %v761_v13  ;;  %v1760_v13 = vld [vmem:[%s1705_s7] ss:$0 sm:$0xff]  ;;  %s1723_s7 = sld [smem:[%s2542_s0 + %s2216_s4]]  }
 0x6bc   :  { %1931 = vmatpush3.bf16.msra.mxu0 %v2065_v11  ;;  %1934 = vmatprep.mubr.msk.bf16.mxu0 %vm2179_vm0, %v2177_v0 }
 0x6bd   :  { %1932 = vmatprep.subr.bf16.mxu0 %v2177_v0 }
 0x6c0   :  { %1933 = vmatpush3.bf16.msra.mxu0 %v2066_v14 }
 0x6c1   :  { %1950 = vmatprep.subr.bf16.mxu0 %v2177_v0 }
 0x6c3   :  { %1935 = vmatmul.mubr.msk.bf16.vlgmr.msra.gmra.mrb[8].mxu0 %vm309_vm1, %v975_v17 }
 0x6c4   :  { %1958 = vmatprep.mubr.msk.bf16.mxu0 %vm2179_vm0, %v2177_v0 }
 0x78e   :  { %v829_v19 = vpop.f32.mrb[4].mxu0 }
 0x78f   :  { %v830_v20 = vadd.f32 %v1754_v18, %v829_v19  ;;  %v1916_v21 = vpop.f32.mrb[5].mxu0 }
 0x790   :  { %v832_v22 = vpop.f32.mrb[6].mxu0 }
 0x791   :  { %v833_v23 = vadd.f32 %v1754_v18, %v832_v22  ;;  %v1917_v24 = vpop.f32.mrb[7].mxu0  ;;  %v836_v25 = vsel %vm354_vm2, %v830_v20, 0.0 }
 0x792   :  { %837 = vadd.xlane.f32.xlu0 %v836_v25  ;;  %v1772_v24 = vld [vmem:[%s1711_s15] ss:$0 sm:$0xff]  ;;  %s1726_s15 = sld [smem:[%s2542_s0 + %s2218_s12]]  }
 0x793   :  { %v839_v26 = vsel %vm354_vm2, %v833_v23, 0.0 }
 0x794   :  { %840 = vadd.xlane.f32.xlu1 %v839_v26 }
 0x796   :  { %v1031_v28 = vpop.f32.mrb[8].mxu0 }
 0x797   :  { %v1032_v29 = vadd.f32 %v1768_v27, %v1031_v28  ;;  %v1936_v30 = vpop.f32.mrb[9].mxu0 }
 0x798   :  { %v1034_v31 = vpop.f32.mrb[10].mxu0 }
 0x799   :  { %v1035_v32 = vadd.f32 %v1768_v27, %v1034_v31  ;;  %v1038_v33 = vsel %vm354_vm2, %v1032_v29, 0.0  ;;  %v1937_v34 = vpop.f32.mrb[11].mxu0 }
 0x79a   :  { %1039 = vadd.xlane.f32.xlu0 %v1038_v33 }
 0x79b   :  { %v1041_v35 = vsel %vm354_vm2, %v1035_v32, 0.0 }
 0x79c   :  { %1042 = vadd.xlane.f32.xlu1 %v1041_v35 }
 0x81f   :  { %v838_v36 = vpop.xlane.xlu0 %837 }
 0x820   :  { %v842_v37 = vmul.f32 0.015625, %v838_v36 }
 0x821   :  { %v841_v38 = vpop.xlane.xlu1 %840 }
 0x822   :  { %v844_v39 = vsub.f32 %v830_v20, %v842_v37  ;;  %v843_v40 = vmul.f32 0.015625, %v841_v38 }
 0x824   :  { %v2360_v41 = vsub.f32 %v833_v23, %v843_v40  ;;  %v846_v42 = vmul.f32 %v844_v39, %v844_v39 }
 0x826   :  { %v848_v43 = vsel %vm354_vm2, %v846_v42, 0.0  ;;  %v847_v44 = vmul.f32 %v2360_v41, %v2360_v41 }
 0x827   :  { %849 = vadd.xlane.f32.xlu0 %v848_v43  ;;  %v1040_v45 = vpop.xlane.xlu0 %1039 }
 0x828   :  { %v1044_v46 = vmul.f32 0.015625, %v1040_v45  ;;  %v851_v47 = vsel %vm354_vm2, %v847_v44, 0.0 }
 0x829   :  { %852 = vadd.xlane.f32.xlu1 %v851_v47  ;;  %v1043_v48 = vpop.xlane.xlu1 %1042 }
 0x82a   :  { %v2366_v49 = vsub.f32 %v1032_v29, %v1044_v46  ;;  %v1045_v50 = vmul.f32 0.015625, %v1043_v48  ;;  %v1773_v29 = vld [vmem:[%s1712_s19] ss:$0 sm:$0xff]  ;;  %s1727_s19 = sld [smem:[%s2542_s0 + %s2219_s16]]  }
 0x82c   :  { %v2368_v51 = vsub.f32 %v1035_v32, %v1045_v50  ;;  %v1048_v52 = vmul.f32 %v2366_v49, %v2366_v49 }
 0x82e   :  { %v1050_v53 = vsel %vm354_vm2, %v1048_v52, 0.0  ;;  %v1049_v54 = vmul.f32 %v2368_v51, %v2368_v51 }
 0x82f   :  { %1051 = vadd.xlane.f32.xlu0 %v1050_v53 }
 0x830   :  { %v1053_v55 = vsel %vm354_vm2, %v1049_v54, 0.0 }
 0x831   :  { %1054 = vadd.xlane.f32.xlu1 %v1053_v55 }
 0x8b4   :  { %v850_v60 = vpop.xlane.xlu0 %849 }
 0x8b5   :  { %v854_v61 = vmul.f32 0.015625, %v850_v60 }
 0x8b6   :  { %v853_v62 = vpop.xlane.xlu1 %852 }
 0x8b7   :  { %v856_v63 = vadd.f32 1e-05, %v854_v61  ;;  %v855_v1 = vmul.f32 0.015625, %v853_v62 }
 0x8b9   :  { %2129 = vrsqrt.f32 %v856_v63  ;;  %v857_v2 = vadd.f32 1e-05, %v855_v1  ;;  %v2071_v1 = vld [vmem:[%s2384_s3] sm:$0xff]  }
 0x8bb   :  { %2131 = vrsqrt.f32 %v857_v2 }
 0x8bc   :  { %v1052_v3 = vpop.xlane.xlu0 %1051 }
 0x8bd   :  { %v1056_v4 = vmul.f32 0.015625, %v1052_v3  ;;  %v2072_v3 = vld [vmem:[%s2384_s3 + $0x8] sm:$0xff]  }
 0x8be   :  { %v1055_v5 = vpop.xlane.xlu1 %1054 }
 0x8bf   :  { %v1058_v6 = vadd.f32 1e-05, %v1056_v4  ;;  %v1057_v7 = vmul.f32 0.015625, %v1055_v5  ;;  %v2073_v5 = vld [vmem:[%s2384_s3 + $0x10] sm:$0xff]  }
 0x8c1   :  { %2133 = vrsqrt.f32 %v1058_v6  ;;  %v1059_v8 = vadd.f32 1e-05, %v1057_v7 }
 0x8c3   :  { %v2130_v11 = vpop.eup %2129  ;;  %2135 = vrsqrt.f32 %v1059_v8 }
 0x8c4   :  { %v860_v14 = vmul.f32 %v2130_v11, %v844_v39 }
 0x8c5   :  { %v2132_v15 = vpop.eup %2131 }
 0x8c6   :  { %v868_v17 = vmul.f32 %v1760_v13, %v860_v14  ;;  %v861_v18 = vmul.f32 %v2132_v15, %v2360_v41 }
 0x8c8   :  { %v876_v19 = vadd.f32 %v1761_v16, %v868_v17  ;;  %v869_v20 = vmul.f32 %v1760_v13, %v861_v18  ;;  %v2074_v13 = vld [vmem:[%s2384_s3 + $0x18] sm:$0xff]   ;;  %v2075_v18 = vld [vmem:[%s1720_s23] sm:$0xff]   ;;  %s1725_s3 = sld [smem:[%s2542_s0 + %s2215_s30]]  }
 0x8ca   :  { %v878_v21 = vmin.f32 %v876_v19, 20.0  ;;  %v877_v22 = vadd.f32 %v1761_v16, %v869_v20  ;;  %vm888_vm9 = vcmp.gt.f32.partialorder %v876_v19, 20.0  ;;  %v1762_v20 = vld [vmem:[%s1708_s27] ss:$0 sm:$0xff] }
 0x8cb   :  { %v2134_v23 = vpop.eup %2133 }
 0x8cc   :  { %v880_v25 = vmul.f32 1.442695, %v878_v21  ;;  %v879_v26 = vmin.f32 %v877_v22, 20.0  ;;  %v1062_v27 = vmul.f32 %v2134_v23, %v2366_v49  ;;  %vm889_vm10 = vcmp.gt.f32.partialorder %v877_v22, 20.0 }
 0x8cd   :  { %v2136_v28 = vpop.eup %2135 }
 0x8ce   :  { %2137 = vpow2.f32 %v880_v25  ;;  %v882_v30 = vmul.f32 1.442695, %v879_v26  ;;  %v1070_v31 = vmul.f32 %v1772_v24, %v1062_v27  ;;  %v1063_v32 = vmul.f32 %v2136_v28, %v2368_v51  ;;  %v1774_v28 = vld [vmem:[%s1714_s1] ss:$0 sm:$0xff] }
 0x8d0   :  { %2139 = vpow2.f32 %v882_v30  ;;  %v2403_v33 = vadd.f32 %v1773_v29, %v1070_v31  ;;  %v1071_v34 = vmul.f32 %v1772_v24, %v1063_v32 }
 0x8d2   :  { %v1080_v35 = vmin.f32 %v2403_v33, 20.0  ;;  %v1079_v36 = vadd.f32 %v1773_v29, %v1071_v34  ;;  %vm1090_vm12 = vcmp.gt.f32.partialorder %v2403_v33, 20.0 }
 0x8d4   :  { %v1082_v37 = vmul.f32 1.442695, %v1080_v35  ;;  %v1081_v38 = vmin.f32 %v1079_v36, 20.0  ;;  %vm1091_vm11 = vcmp.gt.f32.partialorder %v1079_v36, 20.0 }
 0x8d6   :  { %2141 = vpow2.f32 %v1082_v37  ;;  %v1084_v39 = vmul.f32 1.442695, %v1081_v38 }
 0x8d8   :  { %v2138_v40 = vpop.eup %2137  ;;  %2143 = vpow2.f32 %v1084_v39 }
 0x8d9   :  { %v884_v41 = vadd.f32 2.0, %v2138_v40 }
 0x8da   :  { %v2140_v42 = vpop.eup %2139 }
 0x8db   :  { %v885_v43 = vadd.f32 2.0, %v2140_v42  ;;  %v886_v44 = vmul.f32 %v2138_v40, %v884_v41 }
 0x8dd   :  { %v887_v45 = vmul.f32 %v2140_v42, %v885_v43  ;;  %v892_v46 = vadd.f32 2.0, %v886_v44  ;;  %v890_v55 = vmul.f32 %v886_v44, %v876_v19 }
 0x8df   :  { %v893_v47 = vadd.f32 2.0, %v887_v45  ;;  %2145 = vrcp.f32 %v892_v46  ;;  %v891_v58 = vmul.f32 %v887_v45, %v877_v22 }
 0x8e0   :  { %v2142_v48 = vpop.eup %2141 }
 0x8e1   :  { %2147 = vrcp.f32 %v893_v47  ;;  %v1086_v49 = vadd.f32 2.0, %v2142_v48  ;;  %v2077_v47 = vld [vmem:[%s1717_s5] sm:$0xff]  }
 0x8e2   :  { %v2144_v50 = vpop.eup %2143  ;;  %1951 = vmatpush3.bf16.msra.mxu0 %v2077_v47  ;;  %v1497_v47 = vlaneseq }
 0x8e3   :  { %v1087_v51 = vadd.f32 2.0, %v2144_v50  ;;  %v1088_v52 = vmul.f32 %v2142_v48, %v1086_v49  ;;  %1952 = vmatprep.subr.bf16.mxu0 %v2177_v0 }
 0x8e5   :  { %v1089_v53 = vmul.f32 %v2144_v50, %v1087_v51  ;;  %v1094_v57 = vadd.f32 2.0, %v1088_v52  ;;  %v1092_v8 = vmul.f32 %v1088_v52, %v2403_v33  ;;  %v2078_v50 = vld [vmem:[%s1717_s5 + $0x8] sm:$0xff]  }
 0x8e6   :  { %1953 = vmatpush3.bf16.msra.mxu0 %v2078_v50  ;;  %v1797_v50 = vld [vmem:[%s1722_s29] ss:$0 sm:$0xff] }
 0x8e7   :  { %v1095_v54 = vadd.f32 2.0, %v1089_v53  ;;  %v1093_v6 = vmul.f32 %v1089_v53, %v1079_v36  ;;  %v2079_v53 = vld [vmem:[%s1717_s5 + $0x10] sm:$0xff]   ;;  %1954 = vmatprep.subr.bf16.mxu0 %v2177_v0 }
 0x8e9   :  { %v2146_v56 = vpop.eup %2145  ;;  %2149 = vrcp.f32 %v1095_v54  ;;  %v2080_v54 = vld [vmem:[%s1717_s5 + $0x18] sm:$0xff]  }
 0x8ea   :  { %v895_v59 = vmul.f32 %v2146_v56, %v890_v55  ;;  %2151 = vrcp.f32 %v1094_v57  ;;  %1955 = vmatpush3.bf16.msra.mxu0 %v2079_v53  ;;  %v2083_v55 = vld [vmem:[%s2460_s13] sm:$0xff]  }
 0x8eb   :  { %v2148_v60 = vpop.eup %2147  ;;  %1956 = vmatprep.subr.bf16.mxu0 %v2177_v0 }
 0x8ec   :  { %v897_v61 = vmul.f32 %v2148_v60, %v891_v58  ;;  %v898_v62 = vsel %vm888_vm9, %v876_v19, %v895_v59  ;;  %v2076_v19 = vld [vmem:[%s1720_s23 + $0x8] sm:$0xff]  }
 0x8ee   :  { %v899_v63 = vsel %vm889_vm10, %v877_v22, %v897_v61  ;;  %1957 = vmatpush3.bf16.msra.mxu0 %v2080_v54 }
 0x8ef   :  { %v900_v2 = vpack.c.bf16 %v899_v63, %v898_v62  ;;  %1970 = vmatprep.subr.bf16.mxu0 %v2177_v0  ;;  %v1780_v63 = vld [vmem:[%s1715_s17] ss:$0 sm:$0xff] }
 0x8f1   :  { %1927 = vmatmul.mubr.msk.bf16.vlgmr.msra.gmra.mrb[12].mxu1 %vm354_vm2, %v900_v2 }
 0x8f2   :  { %1939 = vmatpush3.bf16.msra.mxu1 %v2071_v1  ;;  %1946 = vmatprep.mubr.msk.bf16.mxu1 %vm2179_vm0, %v2177_v0 }
 0x8f3   :  { %1940 = vmatprep.subr.bf16.mxu1 %v2177_v0  ;;  %v2150_v4 = vpop.eup %2149 }
 0x8f4   :  { %v2152_v7 = vpop.eup %2151  ;;  %v1099_v11 = vmul.f32 %v2150_v4, %v1093_v6 }
 0x8f5   :  { %v1097_v14 = vmul.f32 %v2152_v7, %v1092_v8 }
 0x8f6   :  { %1941 = vmatpush3.bf16.msra.mxu1 %v2072_v3  ;;  %v1101_v15 = vsel %vm1091_vm11, %v1079_v36, %v1099_v11  ;;  %v1781_v3 = vld [vmem:[%s1716_s21] ss:$0 sm:$0xff] }
 0x8f7   :  { %1942 = vmatprep.subr.bf16.mxu1 %v2177_v0  ;;  %v1100_v16 = vsel %vm1090_vm12, %v2403_v33, %v1097_v14 }
 0x8f8   :  { %v1102_v17 = vpack.c.bf16 %v1101_v15, %v1100_v16 }
 0x8fa   :  { %1943 = vmatpush3.bf16.msra.mxu1 %v2073_v5 }
 0x8fb   :  { %1944 = vmatprep.subr.bf16.mxu1 %v2177_v0 }
 0x8fe   :  { %1945 = vmatpush3.bf16.msra.mxu1 %v2074_v13 }
 0x8ff   :  { %1962 = vmatprep.subr.bf16.mxu1 %v2177_v0 }
 0x901   :  { %1947 = vmatmul.mubr.msk.bf16.vlgmr.msra.gmra.mrb[16].mxu1 %vm354_vm2, %v1102_v17 }
 0x902   :  { %1966 = vmatprep.mubr.msk.bf16.mxu1 %vm2179_vm0, %v2177_v0  ;;  %1963 = vmatpush3.bf16.msra.mxu1 %v2075_v18 }
 0x903   :  { %1964 = vmatprep.subr.bf16.mxu1 %v2177_v0 }
 0x906   :  { %1965 = vmatpush3.bf16.msra.mxu1 %v2076_v19 }
 0x907   :  { %1978 = vmatprep.subr.bf16.mxu1 %v2177_v0 }
 0x9c4   :  { %v968_v21 = vpop.f32.mrb[12].mxu1 }
 0x9c5   :  { %v1928_v22 = vpop.f32.mrb[13].mxu1  ;;  %v969_v24 = vadd.f32 %v1762_v20, %v968_v21 }
 0x9c6   :  { %v971_v23 = vpop.f32.mrb[14].mxu1 }
 0x9c7   :  { %v972_v25 = vadd.f32 %v1762_v20, %v971_v23  ;;  %v1929_v26 = vpop.f32.mrb[15].mxu1 }
 0x9c9   :  { %v1317_v27 = vpack.c.bf16 %v972_v25, %v969_v24 }
 0x9cb   :  { %1967 = vmatmul.mubr.msk.bf16.vlgmr.msra.gmra.mrb[20].mxu1 %vm309_vm1, %v1317_v27 }
 0x9cc   :  { %1982 = vmatprep.mubr.msk.bf16.mxu1 %vm2179_vm0, %v2177_v0  ;;  %1979 = vmatpush3.bf16.msra.mxu1 %v2083_v55 }
 0x9cd   :  { %1980 = vmatprep.subr.bf16.mxu1 %v2177_v0 }
 0x9d4   :  { %v1170_v29 = vpop.f32.mrb[16].mxu1 }
 0x9d5   :  { %v1171_v30 = vadd.f32 %v1774_v28, %v1170_v29  ;;  %v1948_v31 = vpop.f32.mrb[17].mxu1 }
 0x9d6   :  { %v1173_v32 = vpop.f32.mrb[18].mxu1 }
 0x9d7   :  { %v1174_v33 = vadd.f32 %v1774_v28, %v1173_v32  ;;  %v1949_v34 = vpop.f32.mrb[19].mxu1  ;;  %v1177_v35 = vsel %vm354_vm2, %v1171_v30, 0.0  ;;  %v2081_v32 = vld [vmem:[%s2455_s9] sm:$0xff]  }
 0x9d8   :  { %1178 = vadd.xlane.f32.xlu0 %v1177_v35  ;;  %v2082_v34 = vld [vmem:[%s2455_s9 + $0x8] sm:$0xff]  }
 0x9d9   :  { %v1180_v36 = vsel %vm354_vm2, %v1174_v33, 0.0  ;;  %v2084_v35 = vld [vmem:[%s2460_s13 + $0x8] sm:$0xff]  }
 0x9da   :  { %1181 = vadd.xlane.f32.xlu1 %v1180_v36  ;;  %1981 = vmatpush3.bf16.msra.mxu1 %v2084_v35  ;;  %v1782_v36 = vld [vmem:[%s1718_s25] ss:$0 sm:$0xff] }
 0xa65   :  { %v1179_v37 = vpop.xlane.xlu0 %1178 }
 0xa66   :  { %v1183_v38 = vmul.f32 0.015625, %v1179_v37 }
 0xa67   :  { %v1182_v39 = vpop.xlane.xlu1 %1181 }
 0xa68   :  { %v1185_v40 = vsub.f32 %v1171_v30, %v1183_v38  ;;  %v1184_v41 = vmul.f32 0.015625, %v1182_v39 }
 0xa6a   :  { %v1186_v42 = vsub.f32 %v1174_v33, %v1184_v41  ;;  %v1187_v43 = vmul.f32 %v1185_v40, %v1185_v40 }
 0xa6c   :  { %v1189_v44 = vsel %vm354_vm2, %v1187_v43, 0.0  ;;  %v1188_v45 = vmul.f32 %v1186_v42, %v1186_v42 }
 0xa6d   :  { %1190 = vadd.xlane.f32.xlu0 %v1189_v44 }
 0xa6e   :  { %v1192_v46 = vsel %vm354_vm2, %v1188_v45, 0.0 }
 0xa6f   :  { %1193 = vadd.xlane.f32.xlu1 %v1192_v46 }
 0xa9e   :  { %v2444_v48 = vpop.f32.mrb[20].mxu1 }
 0xa9f   :  { %v1968_v49 = vpop.f32.mrb[21].mxu1 }
 0xaa0   :  { %v2446_v51 = vpop.f32.mrb[22].mxu1  ;;  %v2493_v49 = vand.u32 127, %v1497_v47 }
 0xaa1   :  { %v1969_v52 = vpop.f32.mrb[23].mxu1 }
 0xaa2   :  { %vm1499_vm15 = vcmp.lt.s32.totalorder %v2493_v49, 64 }
 0xafa   :  { %v1191_v56 = vpop.xlane.xlu0 %1190 }
 0xafb   :  { %v1195_v57 = vmul.f32 0.015625, %v1191_v56 }
 0xafc   :  { %v1194_v58 = vpop.xlane.xlu1 %1193 }
 0xafd   :  { %v1197_v59 = vadd.f32 1e-05, %v1195_v57  ;;  %v1196_v60 = vmul.f32 0.015625, %v1194_v58 }
 0xaff   :  { %2153 = vrsqrt.f32 %v1197_v59  ;;  %v1198_v61 = vadd.f32 1e-05, %v1196_v60 }
 0xb01   :  { %2155 = vrsqrt.f32 %v1198_v61 }
 0xb09   :  { %v2154_v62 = vpop.eup %2153 }
 0xb0a   :  { %v1201_v1 = vmul.f32 %v2154_v62, %v1185_v40 }
 0xb0b   :  { %v2156_v2 = vpop.eup %2155 }
 0xb0c   :  { %v1209_v4 = vmul.f32 %v1780_v63, %v1201_v1  ;;  %v1202_v5 = vmul.f32 %v2156_v2, %v1186_v42 }
 0xb0e   :  { %v1217_v6 = vadd.f32 %v1781_v3, %v1209_v4  ;;  %v1210_v7 = vmul.f32 %v1780_v63, %v1202_v5 }
 0xb10   :  { %v1219_v8 = vmin.f32 %v1217_v6, 20.0  ;;  %v1218_v11 = vadd.f32 %v1781_v3, %v1210_v7  ;;  %vm1229_vm13 = vcmp.gt.f32.partialorder %v1217_v6, 20.0 }
 0xb12   :  { %v1221_v13 = vmul.f32 1.442695, %v1219_v8  ;;  %v1220_v14 = vmin.f32 %v1218_v11, 20.0  ;;  %vm1230_vm14 = vcmp.gt.f32.partialorder %v1218_v11, 20.0 }
 0xb14   :  { %2157 = vpow2.f32 %v1221_v13  ;;  %v1223_v15 = vmul.f32 1.442695, %v1220_v14 }
 0xb16   :  { %2159 = vpow2.f32 %v1223_v15 }
 0xb1e   :  { %v2158_v16 = vpop.eup %2157 }
 0xb1f   :  { %v1225_v17 = vadd.f32 2.0, %v2158_v16 }
 0xb20   :  { %v2160_v18 = vpop.eup %2159 }
 0xb21   :  { %v1226_v19 = vadd.f32 2.0, %v2160_v18  ;;  %v1227_v20 = vmul.f32 %v2158_v16, %v1225_v17 }
 0xb23   :  { %v1228_v21 = vmul.f32 %v2160_v18, %v1226_v19  ;;  %v1233_v22 = vadd.f32 2.0, %v1227_v20  ;;  %v1231_v24 = vmul.f32 %v1227_v20, %v1217_v6  ;;  %v2085_v20 = vld [vmem:[%s1725_s3] sm:$0xff]  }
 0xb25   :  { %v1234_v23 = vadd.f32 2.0, %v1228_v21  ;;  %2161 = vrcp.f32 %v1233_v22  ;;  %v1232_v26 = vmul.f32 %v1228_v21, %v1218_v11  ;;  %v2086_v21 = vld [vmem:[%s1725_s3 + $0x8] sm:$0xff]   ;;  %v2087_v22 = vld [vmem:[%s1725_s3 + $0x10] sm:$0xff]  }
 0xb27   :  { %2163 = vrcp.f32 %v1234_v23  ;;  %v2088_v23 = vld [vmem:[%s1725_s3 + $0x18] sm:$0xff]  }
 0xb2f   :  { %v2162_v25 = vpop.eup %2161 }
 0xb30   :  { %v1236_v27 = vmul.f32 %v2162_v25, %v1231_v24  ;;  %v2089_v24 = vld [vmem:[%s1725_s3 + $0x20] sm:$0xff]   ;;  %v2090_v25 = vld [vmem:[%s1725_s3 + $0x28] sm:$0xff]  }
 0xb31   :  { %v2164_v28 = vpop.eup %2163 }
 0xb32   :  { %v1238_v29 = vmul.f32 %v2164_v28, %v1232_v26  ;;  %v1239_v30 = vsel %vm1229_vm13, %v1217_v6, %v1236_v27  ;;  %v2091_v26 = vld [vmem:[%s1725_s3 + $0x30] sm:$0xff]   ;;  %v2092_v27 = vld [vmem:[%s1725_s3 + $0x38] sm:$0xff]  }
 0xb34   :  { %v1240_v31 = vsel %vm1230_vm14, %v1218_v11, %v1238_v29 }
 0xb35   :  { %v1241_v33 = vpack.c.bf16 %v1240_v31, %v1239_v30 }
 0xb37   :  { %1959 = vmatmul.mubr.msk.bf16.vlgmr.msra.gmra.mrb[12].mxu0 %vm354_vm2, %v1241_v33  ;;  %vm1680_vm2 = vcmask 130048  }
 0xb38   :  { %1971 = vmatpush3.bf16.msra.mxu0 %v2081_v32  ;;  %1974 = vmatprep.mubr.msk.bf16.mxu0 %vm2179_vm0, %v2177_v0 }
 0xb39   :  { %1972 = vmatprep.subr.bf16.mxu0 %v2177_v0 }
 0xb3c   :  { %1973 = vmatpush3.bf16.msra.mxu0 %v2082_v34 }
 0xb3d   :  { %1986 = vmatprep.subr.bf16.mxu0 %v2177_v0 }
 0xb3f   :  { %1975 = vmatmul.mubr.msk.bf16.vlgmr.msra.gmra.mrb[16].mxu0 %vm309_vm1, %v1316_v12 }
 0xb40   :  { %2002 = vmatprep.mubr.msk.bf16.mxu0 %vm2179_vm0, %v2177_v0  ;;  %1987 = vmatpush3.bf16.msra.mxu0 %v2085_v20 }
 0xb41   :  { %1988 = vmatprep.subr.bf16.mxu0 %v2177_v0 }
 0xb44   :  { %1989 = vmatpush3.bf16.msra.mxu0 %v2086_v21 }
 0xb45   :  { %1990 = vmatprep.subr.bf16.mxu0 %v2177_v0 }
 0xb48   :  { %1991 = vmatpush3.bf16.msra.mxu0 %v2087_v22 }
 0xb49   :  { %1992 = vmatprep.subr.bf16.mxu0 %v2177_v0 }
 0xb4c   :  { %1993 = vmatpush3.bf16.msra.mxu0 %v2088_v23 }
 0xb4d   :  { %1994 = vmatprep.subr.bf16.mxu0 %v2177_v0 }
 0xb50   :  { %1995 = vmatpush3.bf16.msra.mxu0 %v2089_v24 }
 0xb51   :  { %1996 = vmatprep.subr.bf16.mxu0 %v2177_v0 }
 0xb54   :  { %1997 = vmatpush3.bf16.msra.mxu0 %v2090_v25 }
 0xb55   :  { %1998 = vmatprep.subr.bf16.mxu0 %v2177_v0 }
 0xb58   :  { %1999 = vmatpush3.bf16.msra.mxu0 %v2091_v26 }
 0xb59   :  { %2000 = vmatprep.subr.bf16.mxu0 %v2177_v0 }
 0xb5c   :  { %2001 = vmatpush3.bf16.msra.mxu0 %v2092_v27 }
 0xc0a   :  { %v1309_v37 = vpop.f32.mrb[12].mxu0 }
 0xc0b   :  { %v1960_v38 = vpop.f32.mrb[13].mxu0  ;;  %v1310_v40 = vadd.f32 %v1782_v36, %v1309_v37 }
 0xc0c   :  { %v1312_v39 = vpop.f32.mrb[14].mxu0 }
 0xc0d   :  { %v1313_v41 = vadd.f32 %v1782_v36, %v1312_v39  ;;  %v1961_v42 = vpop.f32.mrb[15].mxu0 }
 0xc0f   :  { %v1430_v9 = vpack.c.bf16 %v1313_v41, %v1310_v40  ;;  %v1798_v40 = vld [vmem:[%s1723_s7] ss:$0 sm:$0xff] }
 0xc11   :  { %1983 = vmatmul.mubr.msk.bf16.vlgmr.msra.gmra.mrb[24].mxu1 %vm309_vm1, %v1430_v9  ;;  %v1799_v9 = vld [vmem:[%s1724_s11] ss:$0 sm:$0xff] }
 0xc12   :  { %v1423_v10 = vpop.f32.mrb[16].mxu0 }
 0xc13   :  { %v1424_v12 = vadd.f32 %v1423_v10, %v2444_v48  ;;  %v1976_v43 = vpop.f32.mrb[17].mxu0 }
 0xc14   :  { %v1426_v44 = vpop.f32.mrb[18].mxu0 }
 0xc15   :  { %v1427_v45 = vadd.f32 %v1426_v44, %v2446_v51  ;;  %v1977_v46 = vpop.f32.mrb[19].mxu0 }
 0xce4   :  { %v1480_v52 = vpop.f32.mrb[24].mxu1 }
 0xce5   :  { %v1487_v53 = vadd.f32 %v1480_v52, %v1424_v12  ;;  %v1984_v54 = vpop.f32.mrb[25].mxu1 }
 0xce6   :  { %v1483_v55 = vpop.f32.mrb[26].mxu1 }
 0xce7   :  { %v1495_v48 = vadd.f32 %v1797_v50, %v1487_v53  ;;  %v1488_v56 = vadd.f32 %v1483_v55, %v1427_v45  ;;  %v1985_v57 = vpop.f32.mrb[27].mxu1 }
 0xce9   :  { %v1496_v51 = vadd.f32 %v1797_v50, %v1488_v56  ;;  %v1500_v58 = vsel %vm1499_vm15, %v1495_v48, 0.0  ;;  %v1508_v60 = vsel %vm1499_vm15, 0.0, %v1495_v48 }
 0xcea   :  { %1502 = vadd.xlane.f32.xlu0 %v1500_v58 }
 0xceb   :  { %v1501_v59 = vsel %vm1499_vm15, %v1496_v51, 0.0  ;;  %v1509_v61 = vsel %vm1499_vm15, 0.0, %v1496_v51 }
 0xcec   :  { %1504 = vadd.xlane.f32.xlu1 %v1501_v59 }
 0xcee   :  { %1510 = vadd.xlane.f32.xlu0 %v1508_v60 }
 0xcf0   :  { %1512 = vadd.xlane.f32.xlu1 %v1509_v61 }
 0xd77   :  { %v1503_v62 = vpop.xlane.xlu0 %1502 }
 0xd78   :  { %v1506_v2 = vmul.f32 0.015625, %v1503_v62 }
 0xd79   :  { %v1505_v63 = vpop.xlane.xlu1 %1504 }
 0xd7a   :  { %v1507_v5 = vmul.f32 0.015625, %v1505_v63 }
 0xd7b   :  { %v1511_v1 = vpop.xlane.xlu0 %1510 }
 0xd7c   :  { %v1514_v3 = vmul.f32 0.015625, %v1511_v1 }
 0xd7d   :  { %v1513_v4 = vpop.xlane.xlu1 %1512 }
 0xd7e   :  { %v1516_v6 = vsel %vm1499_vm15, %v1506_v2, %v1514_v3  ;;  %v1515_v7 = vmul.f32 0.015625, %v1513_v4  ;;  %v1800_v4 = vld [vmem:[%s1726_s15] ss:$0 sm:$0xff] }
 0xd7f   :  { %v1518_v8 = vsub.f32 %v1495_v48, %v1516_v6 }
 0xd80   :  { %v1517_v11 = vsel %vm1499_vm15, %v1507_v5, %v1515_v7 }
 0xd81   :  { %v1520_v13 = vmul.f32 %v1518_v8, %v1518_v8  ;;  %v1519_v14 = vsub.f32 %v1496_v51, %v1517_v11 }
 0xd83   :  { %v1522_v15 = vsel %vm1499_vm15, %v1520_v13, 0.0  ;;  %v1521_v16 = vmul.f32 %v1519_v14, %v1519_v14  ;;  %v1530_v18 = vsel %vm1499_vm15, 0.0, %v1520_v13 }
 0xd84   :  { %1524 = vadd.xlane.f32.xlu0 %v1522_v15 }
 0xd85   :  { %v1523_v17 = vsel %vm1499_vm15, %v1521_v16, 0.0  ;;  %v1531_v19 = vsel %vm1499_vm15, 0.0, %v1521_v16 }
 0xd86   :  { %1526 = vadd.xlane.f32.xlu1 %v1523_v17 }
 0xd88   :  { %1532 = vadd.xlane.f32.xlu0 %v1530_v18 }
 0xd8a   :  { %1534 = vadd.xlane.f32.xlu1 %v1531_v19 }
 0xe11   :  { %v1525_v28 = vpop.xlane.xlu0 %1524 }
 0xe12   :  { %v1528_v31 = vmul.f32 0.015625, %v1525_v28 }
 0xe13   :  { %v1527_v29 = vpop.xlane.xlu1 %1526 }
 0xe14   :  { %v1529_v34 = vmul.f32 0.015625, %v1527_v29 }
 0xe15   :  { %v1533_v30 = vpop.xlane.xlu0 %1532 }
 0xe16   :  { %v1536_v32 = vmul.f32 0.015625, %v1533_v30 }
 0xe17   :  { %v1535_v33 = vpop.xlane.xlu1 %1534 }
 0xe18   :  { %v1538_v35 = vsel %vm1499_vm15, %v1528_v31, %v1536_v32  ;;  %v1537_v36 = vmul.f32 0.015625, %v1535_v33 }
 0xe19   :  { %v1540_v37 = vadd.f32 1e-05, %v1538_v35 }
 0xe1a   :  { %v1539_v38 = vsel %vm1499_vm15, %v1529_v34, %v1537_v36 }
 0xe1b   :  { %2165 = vrsqrt.f32 %v1540_v37  ;;  %v1541_v39 = vadd.f32 1e-05, %v1539_v38 }
 0xe1d   :  { %2167 = vrsqrt.f32 %v1541_v39 }
 0xe25   :  { %v2166_v0 = vpop.eup %2165 }
 0xe26   :  { %v1544_v41 = vmul.f32 %v2166_v0, %v1518_v8 }
 0xe27   :  { %v2168_v42 = vpop.eup %2167 }
 0xe28   :  { %v1552_v10 = vmul.f32 %v1798_v40, %v1544_v41  ;;  %v1545_v12 = vmul.f32 %v2168_v42, %v1519_v14 }
 0xe2a   :  { %v1553_v43 = vmul.f32 %v1798_v40, %v1545_v12  ;;  %v1560_v44 = vadd.f32 %v1799_v9, %v1552_v10 }
 0xe2c   :  { %v1561_v45 = vadd.f32 %v1799_v9, %v1553_v43  ;;  %v1562_v46 = vmin.f32 %v1560_v44, 20.0  ;;  %vm1572_vm0 = vcmp.gt.f32.partialorder %v1560_v44, 20.0 }
 0xe2e   :  { %v1563_v47 = vmin.f32 %v1561_v45, 20.0  ;;  %v1564_v49 = vmul.f32 1.442695, %v1562_v46  ;;  %vm1573_vm1 = vcmp.gt.f32.partialorder %v1561_v45, 20.0 }
 0xe30   :  { %2169 = vpow2.f32 %v1564_v49  ;;  %v1566_v50 = vmul.f32 1.442695, %v1563_v47 }
 0xe32   :  { %2171 = vpow2.f32 %v1566_v50 }
 0xe3a   :  { %v2170_v52 = vpop.eup %2169 }
 0xe3b   :  { %v1568_v53 = vadd.f32 2.0, %v2170_v52 }
 0xe3c   :  { %v2172_v54 = vpop.eup %2171 }
 0xe3d   :  { %v1569_v55 = vadd.f32 2.0, %v2172_v54  ;;  %v1570_v48 = vmul.f32 %v2170_v52, %v1568_v53 }
 0xe3f   :  { %v1571_v56 = vmul.f32 %v2172_v54, %v1569_v55  ;;  %v1576_v57 = vadd.f32 2.0, %v1570_v48  ;;  %v1574_v58 = vmul.f32 %v1570_v48, %v1560_v44 }
 0xe41   :  { %v1577_v51 = vadd.f32 2.0, %v1571_v56  ;;  %2173 = vrcp.f32 %v1576_v57  ;;  %v1575_v60 = vmul.f32 %v1571_v56, %v1561_v45 }
 0xe43   :  { %2175 = vrcp.f32 %v1577_v51 }
 0xe4b   :  { %v2174_v59 = vpop.eup %2173 }
 0xe4c   :  { %v1579_v61 = vmul.f32 %v2174_v59, %v1574_v58 }
 0xe4d   :  { %v2176_v62 = vpop.eup %2175 }
 0xe4e   :  { %v1581_v63 = vmul.f32 %v2176_v62, %v1575_v60  ;;  %v1582_v1 = vsel %vm1572_vm0, %v1560_v44, %v1579_v61 }
 0xe50   :  { %v1583_v2 = vsel %vm1573_vm1, %v1561_v45, %v1581_v63 }
 0xe51   :  { %v1584_v3 = vpack.c.bf16 %v1583_v2, %v1582_v1 }
 0xe53   :  { %2003 = vmatmul.mubr.bf16.vlgmr.msra.gmra.mrb[20].mxu0 %v1584_v3 }
 0xf26   :  { %v1673_v5 = vpop.f32.mrb[20].mxu0 }
 0xf27   :  { %v1674_v6 = vadd.f32 %v1800_v4, %v1673_v5  ;;  %v2004_v7 = vpop.f32.mrb[21].mxu0 }
 0xf28   :  { %v1676_v8 = vpop.f32.mrb[22].mxu0 }
 0xf29   :  { %1681 = vst.msk [vmem:[%s1727_s19] sm:$0xff] %vm1680_vm2, %v1674_v6  ;;  %v1677_v11 = vadd.f32 %v1800_v4, %v1676_v8  ;;  %v2005_v13 = vpop.f32.mrb[23].mxu0 }
 0xf2b   :  { %1682 = vst.msk [vmem:[%s1727_s19 + $0x8] sm:$0xff] %vm1680_vm2, %v1677_v11 }

</bundles_post_ra>
